<compile_context>
chip_gen: v7x
topology: tpu7x:2x2x1
jax: 0.10.0
libtpu: 0.0.40
codegen_flags: <defaults>
</compile_context>

<pallas_src>
import functools

import jax
import jax.numpy as jnp
from jax.experimental import pallas as pl
from jax.experimental.pallas import tpu as pltpu

IN_FEATURES = 256 * 20   # 5120
HIDDEN = 1028
H_PAD = 1152             # 1028 padded up to 9 * 128
OUT_FEATURES = 1


def _qe_kernel(x_ref, w1_ref, b1_ref, w2_ref, b2_ref, o_ref, acc_ref):
    k = pl.program_id(1)

    @pl.when(k == 0)
    def _():
        acc_ref[...] = jnp.zeros_like(acc_ref)

    # Partial lin1: accumulate bf16 x_tile @ bf16 W1_tile into an f32 scratch.
    acc_ref[...] += jnp.dot(
        x_ref[...], w1_ref[...], preferred_element_type=jnp.float32
    )

    @pl.when(k == pl.num_programs(1) - 1)
    def _():
        # lin1 bias + ReLU, kept in f32 (epilogue runs once; cheap on all gens).
        h = jnp.maximum(acc_ref[...] + b1_ref[...], 0.0)
        # dropout with p=0 is the identity.
        # TODO(synk): support p > 0 (would need pltpu.prng_random_bits masking).
        # lin2 as a lane-wise multiply + cross-lane reduce (keeps the tiny
        # (N, H_PAD) x (H_PAD, 1) product off the MXU push/pop path).
        out = jnp.sum(h * w2_ref[...], axis=-1, keepdims=True) + b2_ref[...]
        o_ref[...] = out.astype(o_ref.dtype)


def pack_params(w1, b1, w2, b2):
    """One-time packing: bf16 W1, zero-pad HIDDEN -> H_PAD, lin2 weight as a row.

    w1: (5120, 1028) f32   -> (5120, 1152) bf16
    b1: (1, 1028)    f32   -> (1, 1152)    f32
    w2: (1028, 1)    f32   -> (1, 1152)    f32  (transposed row, zero-padded)
    b2: (1, 1)       f32   -> unchanged
    """
    pad = H_PAD - HIDDEN
    w1_p = jnp.pad(w1.astype(jnp.bfloat16), ((0, 0), (0, pad)))
    b1_p = jnp.pad(b1, ((0, 0), (0, pad)))
    w2_row = jnp.pad(w2.reshape(1, HIDDEN), ((0, 0), (0, pad)))
    return w1_p, b1_p, w2_row, b2


@functools.partial(jax.jit, static_argnames=("tk", "tn"))
def qe_forward(x, w1_p, b1_p, w2_row, b2, *, tk=1024, tn=None):
    """x: (N, 5120) f32; packed params from pack_params()."""
    n, k_dim = x.shape
    assert k_dim == IN_FEATURES and k_dim % tk == 0
    if tn is None:
        tn = n if n <= 256 else 256
    assert n % tn == 0 and (tn == n or tn % 8 == 0)

    # Stream activations as bf16 too (tiny cast; W1 dominates bandwidth).
    x_bf = x.astype(jnp.bfloat16)

    grid = (n // tn, k_dim // tk)

    # TODO(synk): for tiny N on v7x, split the K reduction across the two
    # TensorCores (leading parallel axis of size 2 + partial-sum combine)
    # instead of the batch axis, which only engages core 1 once N > tn.
    return pl.pallas_call(
        _qe_kernel,
        out_shape=jax.ShapeDtypeStruct((n, OUT_FEATURES), x.dtype),
        grid_spec=pltpu.PrefetchScalarGridSpec(
            num_scalar_prefetch=0,
            grid=grid,
            in_specs=[
                pl.BlockSpec((tn, tk), lambda i, k: (i, k)),          # x tile (bf16)
                pl.BlockSpec((tk, H_PAD), lambda i, k: (k, 0)),       # W1 tile (bf16)
                pl.BlockSpec((1, H_PAD), lambda i, k: (0, 0)),        # b1 (resident)
                pl.BlockSpec((1, H_PAD), lambda i, k: (0, 0)),        # W2 row (resident)
                pl.BlockSpec((1, OUT_FEATURES), lambda i, k: (0, 0)),  # b2
            ],
            out_specs=pl.BlockSpec((tn, OUT_FEATURES), lambda i, k: (i, 0)),
            scratch_shapes=[pltpu.VMEM((tn, H_PAD), jnp.float32)],
        ),
        compiler_params=pltpu.CompilerParams(
            dimension_semantics=("parallel", "arbitrary"),
            vmem_limit_bytes=32 << 20,
        ),
    )(x_bf, w1_p, b1_p, w2_row, b2)


def init_params(key):
    """Deterministic init mimicking nn.Linear's U(-1/sqrt(fan_in), 1/sqrt(fan_in))."""
    k1, k2, k3, k4 = jax.random.split(key, 4)
    bound1 = 1.0 / jnp.sqrt(IN_FEATURES)
    bound2 = 1.0 / jnp.sqrt(HIDDEN)
    # Stored pre-transposed as (in, out) so the forward computes x @ W.
    w1 = jax.random.uniform(k1, (IN_FEATURES, HIDDEN), jnp.float32, -bound1, bound1)
    b1 = jax.random.uniform(k2, (1, HIDDEN), jnp.float32, -bound1, bound1)
    w2 = jax.random.uniform(k3, (HIDDEN, OUT_FEATURES), jnp.float32, -bound2, bound2)
    b2 = jax.random.uniform(k4, (1, OUT_FEATURES), jnp.float32, -bound2, bound2)
    return w1, b1, w2, b2


def reference_forward(x, w1, b1, w2, b2):
    h = jnp.maximum(x @ w1 + b1, 0.0)
    return h @ w2 + b2


if __name__ == "__main__":
    key = jax.random.PRNGKey(0)
    kx, kp = jax.random.split(key)

    N = 8  # minibatch size
    x = jax.random.normal(kx, (N, IN_FEATURES), jnp.float32)
    w1, b1, w2, b2 = init_params(kp)

    packed = pack_params(w1, b1, w2, b2)
    out = qe_forward(x, *packed)
    out = jax.block_until_ready(out)
    assert out.shape == (N, 1), out.shape

    # Reference with the same bf16 quantization of x / W1 (f32 math): should
    # match the kernel up to accumulation-order rounding.
    x_q = x.astype(jnp.bfloat16).astype(jnp.float32)
    w1_q = w1.astype(jnp.bfloat16).astype(jnp.float32)
    ref_q = reference_forward(x_q, w1_q, b1, w2, b2)
    assert jnp.allclose(out, ref_q, atol=2e-3, rtol=2e-3), (
        f"mismatch vs bf16 reference: max abs err {jnp.max(jnp.abs(out - ref_q))}"
    )

    # Report (not assert) drift vs the full-f32 reference for visibility.
    ref_f32 = reference_forward(x, w1, b1, w2, b2)
    _ = jnp.max(jnp.abs(out - ref_f32))

    print("KERNEL_OK")
</pallas_src>

<mosaic_0001>
module attributes {stable_mosaic.version = 11 : i64} {
  func.func @_qe_kernel(%arg0: i32, %arg1: i32, %arg2: memref<8x1024xbf16, #tpu.memory_space<vmem>>, %arg3: memref<1024x1152xbf16, #tpu.memory_space<vmem>>, %arg4: memref<1x1152xf32, #tpu.memory_space<vmem>>, %arg5: memref<1x1152xf32, #tpu.memory_space<vmem>>, %arg6: memref<1x1xf32, #tpu.memory_space<vmem>>, %arg7: memref<8x1xf32, #tpu.memory_space<vmem>>, %arg8: memref<8x1152xf32, #tpu.memory_space<vmem>>) attributes {dimension_semantics = [#tpu.dimension_semantics<parallel>, #tpu.dimension_semantics<arbitrary>], iteration_bounds = array<i64: 1, 5>, scalar_prefetch = 0 : i64, scratch_operands = 1 : i64, tpu.core_type = #tpu.core_type<tc>, window_params = [{transform_indices = @transform_0, window_bounds = array<i64: 8, 1024>}, {transform_indices = @transform_1, window_bounds = array<i64: 1024, 1152>}, {pipeline_mode = #tpu.pipeline_mode<synchronous>, transform_indices = @transform_2, window_bounds = array<i64: 1, 1152>}, {pipeline_mode = #tpu.pipeline_mode<synchronous>, transform_indices = @transform_3, window_bounds = array<i64: 1, 1152>}, {pipeline_mode = #tpu.pipeline_mode<synchronous>, transform_indices = @transform_4, window_bounds = array<i64: 1, 1>}, {transform_indices = @transform_5, window_bounds = array<i64: 8, 1>}]} {
    %c0_i32 = arith.constant 0 : i32
    %0 = arith.cmpi eq, %arg1, %c0_i32 : i32
    %1 = arith.extui %0 : i1 to i32
    %c0_i32_0 = arith.constant 0 : i32
    %2 = arith.cmpi ne, %1, %c0_i32_0 : i32
    scf.if %2 {
      %cst_9 = arith.constant 0.000000e+00 : f32
      %12 = vector.broadcast %cst_9 : f32 to vector<8x1152xf32>
      %c0_10 = arith.constant 0 : index
      %c0_11 = arith.constant 0 : index
      %13 = vector.load %arg8[%c0_10, %c0_11] : memref<8x1152xf32, #tpu.memory_space<vmem>>, vector<8x1152xf32>
      tpu.vector_store %arg8[%c0_10, %c0_11], %12 {strides = array<i32>} : memref<8x1152xf32, #tpu.memory_space<vmem>>, vector<8x1152xf32>,
    } else {
    }
    %c0 = arith.constant 0 : index
    %c0_1 = arith.constant 0 : index
    %3 = vector.load %arg8[%c0, %c0_1] : memref<8x1152xf32, #tpu.memory_space<vmem>>, vector<8x1152xf32>
    %c0_2 = arith.constant 0 : index
    %c0_3 = arith.constant 0 : index
    %4 = vector.load %arg2[%c0_2, %c0_3] : memref<8x1024xbf16, #tpu.memory_space<vmem>>, vector<8x1024xbf16>
    %c0_4 = arith.constant 0 : index
    %c0_5 = arith.constant 0 : index
    %5 = vector.load %arg3[%c0_4, %c0_5] : memref<1024x1152xbf16, #tpu.memory_space<vmem>>, vector<1024x1152xbf16>
    %cst = arith.constant dense<0.000000e+00> : vector<8x1152xf32>
    %6 = tpu.matmul %4, %5, %cst {dimension_numbers = #tpu.dot_dimension_numbers<[1], [0], [0], [1], [0, 0, 1, 1], [], []>} : vector<8x1024xbf16>, vector<1024x1152xbf16>, vector<8x1152xf32> -> vector<8x1152xf32>
    %7 = arith.addf %3, %6 : vector<8x1152xf32>
    %c0_6 = arith.constant 0 : index
    %c0_7 = arith.constant 0 : index
    %8 = vector.load %arg8[%c0_6, %c0_7] : memref<8x1152xf32, #tpu.memory_space<vmem>>, vector<8x1152xf32>
    tpu.vector_store %arg8[%c0_6, %c0_7], %7 {strides = array<i32>} : memref<8x1152xf32, #tpu.memory_space<vmem>>, vector<8x1152xf32>,
    %c4_i32 = arith.constant 4 : i32
    %9 = arith.cmpi eq, %arg1, %c4_i32 : i32
    %10 = arith.extui %9 : i1 to i32
    %c0_i32_8 = arith.constant 0 : i32
    %11 = arith.cmpi ne, %10, %c0_i32_8 : i32
    scf.if %11 {
      %c0_9 = arith.constant 0 : index
      %c0_10 = arith.constant 0 : index
      %12 = vector.load %arg8[%c0_9, %c0_10] : memref<8x1152xf32, #tpu.memory_space<vmem>>, vector<8x1152xf32>
      %c0_11 = arith.constant 0 : index
      %c0_12 = arith.constant 0 : index
      %13 = vector.load %arg4[%c0_11, %c0_12] : memref<1x1152xf32, #tpu.memory_space<vmem>>, vector<1x1152xf32>
      %14 = vector.broadcast %13 : vector<1x1152xf32> to vector<8x1152xf32>
      %15 = arith.addf %12, %14 : vector<8x1152xf32>
      %cst_13 = arith.constant 0.000000e+00 : f32
      %16 = vector.broadcast %cst_13 : f32 to vector<8x1152xf32>
      %17 = arith.maximumf %15, %16 : vector<8x1152xf32>
      %c0_14 = arith.constant 0 : index
      %c0_15 = arith.constant 0 : index
      %18 = vector.load %arg5[%c0_14, %c0_15] : memref<1x1152xf32, #tpu.memory_space<vmem>>, vector<1x1152xf32>
      %19 = vector.broadcast %18 : vector<1x1152xf32> to vector<8x1152xf32>
      %20 = arith.mulf %17, %19 : vector<8x1152xf32>
      %cst_16 = arith.constant dense<0.000000e+00> : vector<8xf32>
      %21 = vector.multi_reduction <add>, %20, %cst_16 [1] : vector<8x1152xf32> to vector<8xf32>
      %22 = vector.shape_cast %21 : vector<8xf32> to vector<8x1xf32>
      %c0_17 = arith.constant 0 : index
      %c0_18 = arith.constant 0 : index
      %23 = vector.load %arg6[%c0_17, %c0_18] : memref<1x1xf32, #tpu.memory_space<vmem>>, vector<1x1xf32>
      %24 = vector.broadcast %23 : vector<1x1xf32> to vector<8x1xf32>
      %25 = arith.addf %22, %24 : vector<8x1xf32>
      %c0_19 = arith.constant 0 : index
      %c0_20 = arith.constant 0 : index
      %26 = vector.load %arg7[%c0_19, %c0_20] : memref<8x1xf32, #tpu.memory_space<vmem>>, vector<8x1xf32>
      tpu.vector_store %arg7[%c0_19, %c0_20], %25 {strides = array<i32>} : memref<8x1xf32, #tpu.memory_space<vmem>>, vector<8x1xf32>,
    } else {
    }
    return
  }
  func.func @transform_0(%arg0: i32, %arg1: i32) -> (i32, i32) {
    %c0_i32 = arith.constant 0 : i32
    return %arg0, %arg1 : i32, i32
  }
  func.func @transform_1(%arg0: i32, %arg1: i32) -> (i32, i32) {
    %c0_i32 = arith.constant 0 : i32
    %c0_i32_0 = arith.constant 0 : i32
    return %arg1, %c0_i32 : i32, i32
  }
  func.func @transform_2(%arg0: i32, %arg1: i32) -> (i32, i32) {
    %c0_i32 = arith.constant 0 : i32
    %c0_i32_0 = arith.constant 0 : i32
    %c0_i32_1 = arith.constant 0 : i32
    return %c0_i32, %c0_i32_0 : i32, i32
  }
  func.func @transform_3(%arg0: i32, %arg1: i32) -> (i32, i32) {
    %c0_i32 = arith.constant 0 : i32
    %c0_i32_0 = arith.constant 0 : i32
    %c0_i32_1 = arith.constant 0 : i32
    return %c0_i32, %c0_i32_0 : i32, i32
  }
  func.func @transform_4(%arg0: i32, %arg1: i32) -> (i32, i32) {
    %c0_i32 = arith.constant 0 : i32
    %c0_i32_0 = arith.constant 0 : i32
    %c0_i32_1 = arith.constant 0 : i32
    return %c0_i32, %c0_i32_0 : i32, i32
  }
  func.func @transform_5(%arg0: i32, %arg1: i32) -> (i32, i32) {
    %c0_i32 = arith.constant 0 : i32
    %c0_i32_0 = arith.constant 0 : i32
    return %arg0, %c0_i32 : i32, i32
  }
}

</mosaic_0001>

<bundles_post_ra>
// kernel: qe_forward.1
= control target key start
LH: loop header
LB: loop body
LE: loop exit
PB: predicated region body
PF: predicated region fallthrough
CT: control target
= control target key end

     0   :  { %s7714_s0 = inlined_call_operand.vmem [shape: bf16[8,5120], index: 0, kind: input, shape index: {}]   ;;  %s7715_s1 = inlined_call_operand.hbm [shape: bf16[5120,1152], index: 1, kind: input, shape index: {}]   ;;  %s7716_s2 = inlined_call_operand.hbm [shape: f32[1,1152], index: 2, kind: input, shape index: {}]   ;;  %s7717_s3 = inlined_call_operand.hbm [shape: f32[1,1152], index: 3, kind: input, shape index: {}]   ;;  %s7718_s4 = inlined_call_operand.<no memory space> [shape: f32[1,1], index: 4, kind: input, shape index: {}]   ;;  %s7719_s5 = inlined_call_operand.vmem [shape: f32[8,1], index: 5, kind: output, shape index: {}]  }
   0x1   :  { %v10_v0 = vstv %s7718_s4 }
   0x2   :  { %11 = vst [vmem:[#allocation3] sm:$0x1] %v10_v0 }
   0x3   :  { %12 = vsyncpa [#allocation5], 0 }
   0x4   :  { %14 = vsyncpa [#allocation5 + $0x1], 0 }
   0x5   :  { %15 = vsyncpa [#allocation7], 0  ;;  %s6854_s20 = smov 0   ;;  %s6856_s21 = smov 0  }
   0x6   :  { %s6858_s22 = smov 0   ;;  %s6860_s23 = smov 0  }
   0x7   :  { %s6862_s24 = smov 0   ;;  %s6864_s25 = smov 0  }
   0x8 LB: > { %s5058_s4 = sadd.s32 4294967295, %s6813_s25   ;;  %s68_s26 = sadd.s32 1, %s6801_s22  ;;  %s6813_s25 = sphi %s6864_s25, %s21_s25   ;;  %s6809_s24 = sphi %s6862_s24, %s7738_s24   ;;  %s6805_s23 = sphi %s6860_s23, %s7737_s23   ;;  %s6801_s22 = sphi %s6858_s22, %s7736_s22   ;;  %s6797_s21 = sphi %s6856_s21, %s7735_s21   ;;  %s6793_s20 = sphi %s6854_s20, %s7734_s20  }
   0x9   : > { %p75_p0 = scmp.ne.s32.totalorder %s6801_s22, %s6797_s21  ;;  %p76_p1 = scmp.eq.s32.totalorder %s6813_s25, 0 }
   0xa   : > { %p81_p2 = scmp.ne.s32.totalorder %s6797_s21, %s6793_s20  ;;  %p6888_p3 = scmp.eq.s32.totalorder %s5058_s4, 0 }
   0xb   : > { %p77_p4 = por %p76_p1, %p75_p0  ;;  %p5059_p5 = scmp.ge.s32.totalorder %s6813_s25, 1 }
   0xc   : > { %s7725_s27 = scalar_select %p6888_p3, 1, 0 }
   0xd   : > { %p6895_p6 = por %p6888_p3, %p81_p2  ;;  %p181_p7 = scmp.lt.s32.totalorder %s6813_s25, 6 }
   0xe   : > { %s6815_s30 = smov [#allocation6]   ;;  %p5777_p10 = scmp.lt.s32.totalorder %s6813_s25, 5 }
   0xf   : > { %s7726_s28 = scalar_select %p6895_p6, 1, 0 }
  0x10   : > { %p6900_p8 = pnand %p5059_p5, %p181_p7  ;;  %s194_s6 = sshll.u32 %s6815_s30, 4  ;;  %s195_s6 = int_to_ptr.vmem [resolvable:$true] %s194_s6 }
  0x11   : > { %p6913_p12 = pnand %p5777_p10, %p77_p4  ;;  %s6816_s9 = smov [#allocation8]  }
  0x12   : > { %s7727_s29 = scalar_select %p6900_p8, 1, 0 }
  0x13   : > { %p5764_p9 = pneg %p6900_p8  ;;  %s205_s10 = sshll.u32 %s6816_s9, 4  ;;  %s206_s10 = int_to_ptr.vmem [resolvable:$true] %s205_s10 }
  0x14   : > { %s7729_s8 = scalar_select %p6913_p12, 1, 0 }
  0x15   : > { %p6909_p11 = pnand %p5764_p9, %p6888_p3  ;;  %s6673_s13 = scalar_lea.hbm %s7716_s2, 144 }
  0x16   : > { %p6674_p13 = scmp.ne.s32.totalorder %s7716_s2, %s6673_s13  ;;  %p6680_p4 = scmp.lt.u32.totalorder %s6673_s13, %s7716_s2 }
  0x17   : > { %p6675_p0 = pneg %p6909_p11 }
  0x19   : > { %p6676_p1 = pnand %p6675_p0, %p6674_p13 }
  0x1b   : > { %p6677_p2 = pneg %p6676_p1 }
  0x1d   : > { %p6682_p5 = pnand %p6680_p4, %p6677_p2 }
  0x1f   : > { %6685 = shalt.err (!%p6682_p5)
}
  0x20   : > { %s6686_s18 = scalar_lea.vmem %s195_s6, 144  ;;  %s6693_s19 = scalar_lea.vmem %s195_s6, 160 }
  0x21   : > { %p6687_p7 = scmp.ne.s32.totalorder %s195_s6, %s6686_s18  ;;  %p6694_p3 = scmp.lt.s32.totalorder %s195_s6, %s195_s6 }
  0x22   : > { %p6695_p6 = scmp.lt.s32.totalorder %s6693_s19, %s6686_s18 }
  0x23   : > { %p6689_p9 = pnand %p6687_p7, %p6675_p0 }
  0x24   : > { %p6696_p8 = por %p6695_p6, %p6694_p3 }
  0x25   : > { %p6690_p10 = pneg %p6689_p9 }
  0x27   : > { %p6697_p12 = pnand %p6696_p8, %p6690_p10 }
  0x29   : > { %6700 = shalt.err (!%p6697_p12)
}
  0x2a   : > { %5767 = dma.hbm_to_vmem [thread:$0]  (!%p6909_p11), %s7716_s2, 144, %s195_s6, [#allocation7]  }
  0x2b   : > { %s30_s30 = sadd.s32 1, %s6809_s24  ;;  %s6701_s12 = scalar_lea.hbm %s7717_s3, 144 }
  0x2c   : > { %p6702_p3 = scmp.ne.s32.totalorder %s7717_s3, %s6701_s12  ;;  %p6708_p12 = scmp.lt.u32.totalorder %s6701_s12, %s7717_s3 }
  0x2e   : > { %p6704_p6 = pnand %p6702_p3, %p6675_p0 }
  0x30   : > { %p6705_p8 = pneg %p6704_p6 }
  0x32   : > { %p6710_p13 = pnand %p6708_p12, %p6705_p8 }
  0x34   : > { %6713 = shalt.err (!%p6710_p13)
}
  0x35   : > { %s6714_s6 = scalar_lea.vmem %s206_s10, 144  ;;  %s6721_s17 = scalar_lea.vmem %s206_s10, 160 }
  0x36   : > { %p6715_p1 = scmp.ne.s32.totalorder %s206_s10, %s6714_s6  ;;  %p6722_p5 = scmp.lt.s32.totalorder %s206_s10, %s206_s10 }
  0x37   : > { %p6723_p7 = scmp.lt.s32.totalorder %s6721_s17, %s6714_s6 }
  0x38   : > { %p6717_p2 = pnand %p6715_p1, %p6675_p0 }
  0x39   : > { %p6724_p9 = por %p6723_p7, %p6722_p5 }
  0x3a   : > { %p6718_p4 = pneg %p6717_p2 }
  0x3c   : > { %p6725_p10 = pnand %p6724_p9, %p6718_p4 }
  0x3e   : > { %6728 = shalt.err (!%p6725_p10)
}
  0x3f   : > { %5770 = dma.hbm_to_vmem [thread:$0]  (!%p6909_p11), %s7717_s3, 144, %s206_s10, [#allocation7]  }
  0x40   : > { %p31_p0 = scmp.ge.s32.totalorder %s30_s30, 5  ;;  %s232_s20 = sand.u32 1, %s6801_s22  }
  0x41   : > { %s5751_s4 = smul.u32 4608, %s232_s20  ;;  %s6978_s16 = scalar_lea.sflag [#allocation5], %s232_s20 }
  0x42   : > { %s7740_s30 = smov (%p31_p0, %s30_s30), 0  ;;  %s5752_s9 = smul.u32 73728, %s6809_s24 }
  0x43   : > { %s65_s11 = ssub.s32 %s6809_s24, %s7740_s30  ;;  %s236_s7 = scalar_lea.vmem [#allocation4], %s5751_s4 }
  0x44   : > { %s244_s12 = sshll.u32 %s236_s7, 4  ;;  %p66_p3 = scmp.eq.s32.totalorder %s65_s11, 0  ;;  %s6971_s12 = int_to_ptr.vmem [resolvable:$true] %s244_s12 }
  0x45   : > { %s6969_s15 = scalar_lea.hbm %s7715_s1, %s5752_s9  ;;  %p7730_p6 = scmp.ne.s32.totalorder %s7729_s8, 0 }
  0x46   : > { %s6976_s10 = scalar_select %p66_p3, %s6801_s22, %s68_s26  }
  0x47   : > { %s6729_s6 = scalar_lea.hbm %s6969_s15, 73728  ;;  %p6731_p8 = pneg %p7730_p6 }
  0x48   : > { %p6730_p11 = scmp.ne.s32.totalorder %s6969_s15, %s6729_s6  ;;  %s6734_s19 = scalar_lea.hbm %s7715_s1, 368640 }
  0x49   : > { %p6735_p1 = scmp.lt.u32.totalorder %s6969_s15, %s7715_s1  ;;  %p6736_p2 = scmp.lt.u32.totalorder %s6734_s19, %s6729_s6 }
  0x4a   : > { %p6732_p12 = pnand %p6731_p8, %p6730_p11  ;;  %p6738_p5 = scmp.lt.u32.totalorder %s6729_s6, %s6969_s15 }
  0x4b   : > { %p6737_p4 = por %p6736_p2, %p6735_p1 }
  0x4c   : > { %p6733_p13 = pneg %p6732_p12 }
  0x4d   : > { %p6739_p7 = por %p6738_p5, %p6737_p4 }
  0x4f   : > { %p6740_p9 = pnand %p6739_p7, %p6733_p13 }
  0x51   : > { %6743 = shalt.err (!%p6740_p9)
}
  0x52   : > { %s6744_s26 = scalar_lea.vmem %s6971_s12, 73728  ;;  %s6817_s20 = smov [#allocation4]  }
  0x53   : > { %p6745_p10 = scmp.ne.s32.totalorder %s6971_s12, %s6744_s26  ;;  %s6749_s11 = sshll.u32 %s6817_s20, 4  ;;  %s6750_s11 = int_to_ptr.vmem [resolvable:$false] %s6749_s11 }
  0x54   : > { %s6751_s7 = scalar_lea.vmem %s6750_s11, 147456  ;;  %p6752_p11 = scmp.lt.s32.totalorder %s6971_s12, %s6750_s11 }
  0x55   : > { %p6747_p0 = pnand %p6745_p10, %p6731_p8  ;;  %p6753_p12 = scmp.lt.s32.totalorder %s6751_s7, %s6744_s26 }
  0x57   : > { %p6748_p3 = pneg %p6747_p0  ;;  %p6754_p1 = por %p6753_p12, %p6752_p11 }
  0x59   : > { %p6755_p2 = pnand %p6754_p1, %p6748_p3 }
  0x5b   : > { %6758 = shalt.err (!%p6755_p2)
}
  0x5c   : > { %s6818_s13 = smov 576   ;;  %s6819_s14 = smov 36  }
  0x5d   : > { %5774 = dma.hbm_to_vmem [thread:$0]  (!%p7730_p6), %s6969_s15, 73728, %s6971_s12, %s6978_s16, %s6818_s13, %s6818_s13, %s6819_s14  }
  0x5e   : > { %p7731_p8 = scmp.ne.s32.totalorder %s7727_s29, 0 }
  0x5f   : > { %s258_s6 = sand.u32 (!%p7731_p8), 1, %s6797_s21   ;;  %p7732_p13 = scmp.ne.s32.totalorder (!%p7731_p8), %s7726_s28, 0 }
  0x60   : > { %256 = sbr.rel (%p7731_p8) target bundleno = 1076 (0x434), region = 40  ;;  %s259_s18 = scalar_lea.sflag (!%p7731_p8), [#allocation5], %s258_s6 }
  0x61   : > { %s5753_s17 = smul.u32 (!%p7731_p8), 4608, %s258_s6 }
  0x63   : > { %s7009_s19 = scalar_lea.vmem (!%p7731_p8), [#allocation4], %s5753_s17 }
  0x67   : > { %6784 = dma.done.wait (%p7732_p13), %s259_s18, 73728  }
  0x68   : > { %6786 = vsyncadd (%p7732_p13), %s259_s18, 4294893568  ;;  %p7733_p4 = scmp.ne.s32.totalorder %s7725_s27, 0 }
  0x6a   : > { %6788 = dma.done.wait (%p7733_p4), [#allocation7], 288  }
  0x6b   : > { %6790 = vsyncadd (%p7733_p4), [#allocation7], 4294967008  ;;  %s5069_s29 = sshll.u32 %s6805_s23, 3  ;;  %p5071_p5 = scmp.ne.s32.totalorder %s6805_s23, 0 }
  0x6c   : > { %p308_p6 = scmp.lt.s32.totalorder %s5069_s29, 39  ;;  %v6820_v1 = vmov (!%p5071_p5), 0.0  }
  0x6d   : > { %324 = sbr.rel (%p5071_p5) target bundleno = 116 (0x74), region = 56  ;;  %325 = vst [vmem:[#allocation2] sm:$0xff] (!%p5071_p5), %v6820_v1  ;;  %326 = vst [vmem:[#allocation2 + $0x8] sm:$0xff] (!%p5071_p5), %v6820_v1 }
  0x6e   : > { %s7742_s29 = smov (!%p308_p6, %s5069_s29), 39  ;;  %327 = vst [vmem:[#allocation2 + $0x10] sm:$0xff] (!%p5071_p5), %v6820_v1  ;;  %328 = vst [vmem:[#allocation2 + $0x18] sm:$0xff] (!%p5071_p5), %v6820_v1 }
  0x6f   : > { %s5070_s8 = sshll.u32 %s7742_s29, 2  ;;  %329 = vst [vmem:[#allocation2 + $0x20] sm:$0xff] (!%p5071_p5), %v6820_v1  ;;  %330 = vst [vmem:[#allocation2 + $0x28] sm:$0xff] (!%p5071_p5), %v6820_v1 }
  0x70   : > { %s7023_s16 = scalar_lea.vmem %s7714_s0, %s5070_s8  ;;  %331 = vst [vmem:[#allocation2 + $0x30] sm:$0xff] (!%p5071_p5), %v6820_v1  ;;  %332 = vst [vmem:[#allocation2 + $0x38] sm:$0xff] (!%p5071_p5), %v6820_v1 }
  0x71   : > { %333 = vst [vmem:[#allocation2 + $0x40] sm:$0xff] (!%p5071_p5), %v6820_v1 }
  0x74 PF: > { %v5833_v2 = vld [vmem:[%s7009_s19 + $0x4] ss:$36 sps:$4 sm:$0xff]   ;;  %v5839_v6 = vld [vmem:[%s7009_s19 + $0x4c] ss:$36 sps:$4 sm:$0xff]   ;;  %v5845_v10 = vld [vmem:[%s7009_s19 + $0x94] ss:$36 sps:$4 sm:$0xff]  }
  0x75   : > { %v5835_v3 = vld [vmem:[%s7009_s19 + $0x484] ss:$36 sps:$4 sm:$0xff]   ;;  %3959 = vmatprep.subr.bf16.mxu0 %v5833_v2  ;;  %v5841_v7 = vld [vmem:[%s7009_s19 + $0x4cc] ss:$36 sps:$4 sm:$0xff]   ;;  %v5847_v11 = vld [vmem:[%s7009_s19 + $0x514] ss:$36 sps:$4 sm:$0xff]  }
  0x76   : > { %v5837_v4 = vld [vmem:[%s7009_s19] ss:$36 sps:$4 sm:$0xff]   ;;  %4000 = vmatprep.subr.bf16.mxu1 %v5835_v3  ;;  %v5843_v8 = vld [vmem:[%s7009_s19 + $0x48] ss:$36 sps:$4 sm:$0xff]   ;;  %v5849_v12 = vld [vmem:[%s7009_s19 + $0x90] ss:$36 sps:$4 sm:$0xff]  }
  0x77   : > { %v5838_v5 = vld [vmem:[%s7009_s19 + $0x480] ss:$36 sps:$4 sm:$0xff]   ;;  %3960 = vmatpush1.bf16.msra.mxu0 %v5837_v4  ;;  %v5844_v9 = vld [vmem:[%s7009_s19 + $0x4c8] ss:$36 sps:$4 sm:$0xff]   ;;  %v5850_v13 = vld [vmem:[%s7009_s19 + $0x510] ss:$36 sps:$4 sm:$0xff]  }
  0x78   : > { %4001 = vmatpush1.bf16.msra.mxu1 %v5838_v5  ;;  %3961 = vmatprep.subr.bf16.mxu0 %v5839_v6  ;;  %v5851_v14 = vld [vmem:[%s7009_s19 + $0xdc] ss:$36 sps:$4 sm:$0xff]   ;;  %v5857_v18 = vld [vmem:[%s7009_s19 + $0x124] ss:$36 sps:$4 sm:$0xff]   ;;  %v5863_v22 = vld [vmem:[%s7009_s19 + $0x16c] ss:$36 sps:$4 sm:$0xff]  }
  0x79   : > { %4002 = vmatprep.subr.bf16.mxu1 %v5841_v7  ;;  %v5853_v15 = vld [vmem:[%s7009_s19 + $0x55c] ss:$36 sps:$4 sm:$0xff]   ;;  %v5859_v19 = vld [vmem:[%s7009_s19 + $0x5a4] ss:$36 sps:$4 sm:$0xff]   ;;  %v5865_v23 = vld [vmem:[%s7009_s19 + $0x5ec] ss:$36 sps:$4 sm:$0xff]  }
  0x7a   : > { %v5855_v16 = vld [vmem:[%s7009_s19 + $0xd8] ss:$36 sps:$4 sm:$0xff]   ;;  %v5861_v20 = vld [vmem:[%s7009_s19 + $0x120] ss:$36 sps:$4 sm:$0xff]   ;;  %v5867_v24 = vld [vmem:[%s7009_s19 + $0x168] ss:$36 sps:$4 sm:$0xff]  }
  0x7b   : > { %3962 = vmatpush1.bf16.msra.mxu0 %v5843_v8  ;;  %v5856_v17 = vld [vmem:[%s7009_s19 + $0x558] ss:$36 sps:$4 sm:$0xff]   ;;  %v5862_v21 = vld [vmem:[%s7009_s19 + $0x5a0] ss:$36 sps:$4 sm:$0xff]   ;;  %v5868_v25 = vld [vmem:[%s7009_s19 + $0x5e8] ss:$36 sps:$4 sm:$0xff]  }
  0x7c   : > { %4003 = vmatpush1.bf16.msra.mxu1 %v5844_v9  ;;  %3963 = vmatprep.subr.bf16.mxu0 %v5845_v10  ;;  %v5869_v26 = vld [vmem:[%s7009_s19 + $0x1b4] ss:$36 sps:$4 sm:$0xff]   ;;  %v5875_v30 = vld [vmem:[%s7009_s19 + $0x1fc] ss:$36 sps:$4 sm:$0xff]   ;;  %v5881_v34 = vld [vmem:[%s7009_s19 + $0x244] ss:$36 sps:$4 sm:$0xff]  }
  0x7d   : > { %4004 = vmatprep.subr.bf16.mxu1 %v5847_v11  ;;  %v5871_v27 = vld [vmem:[%s7009_s19 + $0x634] ss:$36 sps:$4 sm:$0xff]   ;;  %v5877_v31 = vld [vmem:[%s7009_s19 + $0x67c] ss:$36 sps:$4 sm:$0xff]   ;;  %v5883_v35 = vld [vmem:[%s7009_s19 + $0x6c4] ss:$36 sps:$4 sm:$0xff]  }
  0x7e   : > { %v5873_v28 = vld [vmem:[%s7009_s19 + $0x1b0] ss:$36 sps:$4 sm:$0xff]   ;;  %v5879_v32 = vld [vmem:[%s7009_s19 + $0x1f8] ss:$36 sps:$4 sm:$0xff]   ;;  %v5885_v36 = vld [vmem:[%s7009_s19 + $0x240] ss:$36 sps:$4 sm:$0xff]  }
  0x7f   : > { %3964 = vmatpush1.bf16.msra.mxu0 %v5849_v12  ;;  %v5874_v29 = vld [vmem:[%s7009_s19 + $0x630] ss:$36 sps:$4 sm:$0xff]   ;;  %v5880_v33 = vld [vmem:[%s7009_s19 + $0x678] ss:$36 sps:$4 sm:$0xff]   ;;  %v5886_v37 = vld [vmem:[%s7009_s19 + $0x6c0] ss:$36 sps:$4 sm:$0xff]  }
  0x80   : > { %4005 = vmatpush1.bf16.msra.mxu1 %v5850_v13  ;;  %3965 = vmatprep.subr.bf16.mxu0 %v5851_v14  ;;  %v5887_v38 = vld [vmem:[%s7009_s19 + $0x28c] ss:$36 sps:$4 sm:$0xff]   ;;  %v5893_v42 = vld [vmem:[%s7009_s19 + $0x2d4] ss:$36 sps:$4 sm:$0xff]   ;;  %v5899_v46 = vld [vmem:[%s7009_s19 + $0x31c] ss:$36 sps:$4 sm:$0xff]  }
  0x81   : > { %4006 = vmatprep.subr.bf16.mxu1 %v5853_v15  ;;  %v5889_v39 = vld [vmem:[%s7009_s19 + $0x70c] ss:$36 sps:$4 sm:$0xff]   ;;  %v5895_v43 = vld [vmem:[%s7009_s19 + $0x754] ss:$36 sps:$4 sm:$0xff]   ;;  %v5901_v47 = vld [vmem:[%s7009_s19 + $0x79c] ss:$36 sps:$4 sm:$0xff]  }
  0x82   : > { %v5891_v40 = vld [vmem:[%s7009_s19 + $0x288] ss:$36 sps:$4 sm:$0xff]   ;;  %v5897_v44 = vld [vmem:[%s7009_s19 + $0x2d0] ss:$36 sps:$4 sm:$0xff]   ;;  %v344_v50 = vld [vmem:[%s7023_s16 + $0x8] sm:$0xff]  ;;  %p5656_p7 = scmp.ne.s32.totalorder %s6805_s23, 4 }
  0x83   : > { %3966 = vmatpush1.bf16.msra.mxu0 %v5855_v16  ;;  %v5892_v41 = vld [vmem:[%s7009_s19 + $0x708] ss:$36 sps:$4 sm:$0xff]   ;;  %v5898_v45 = vld [vmem:[%s7009_s19 + $0x750] ss:$36 sps:$4 sm:$0xff]   ;;  %v5903_v51 = vld [vmem:[%s7009_s19 + $0x318] ss:$36 sps:$4 sm:$0xff]   ;;  %v7078_v53 = vcombine.high %v344_v50, %v344_v50  ;;  %v7102_v9 = vcombine.low %v344_v50, %v344_v50 }
  0x84   : > { %4007 = vmatpush1.bf16.msra.mxu1 %v5856_v17  ;;  %3967 = vmatprep.subr.bf16.mxu0 %v5857_v18  ;;  %v343_v48 = vld [vmem:[%s7023_s16] sm:$0xff]  ;;  %v5905_v54 = vld [vmem:[%s7009_s19 + $0x364] ss:$36 sps:$4 sm:$0xff]   ;;  %v5911_v58 = vld [vmem:[%s7009_s19 + $0x3ac] ss:$36 sps:$4 sm:$0xff]   ;;  %vm4949_vm0 = vcmask (!%p5656_p7), 7168  }
  0x85   : > { %4008 = vmatprep.subr.bf16.mxu1 %v5859_v19  ;;  %v7073_v49 = vcombine.high %v343_v48, %v343_v48  ;;  %v5904_v52 = vld [vmem:[%s7009_s19 + $0x798] ss:$36 sps:$4 sm:$0xff]   ;;  %v5907_v55 = vld [vmem:[%s7009_s19 + $0x7e4] ss:$36 sps:$4 sm:$0xff]   ;;  %4032 = vmatprep.mubr.bf16.mxu1 %v7078_v53  ;;  %v5913_v59 = vld [vmem:[%s7009_s19 + $0x82c] ss:$36 sps:$4 sm:$0xff]   ;;  %v7100_v8 = vcombine.low %v343_v48, %v343_v48 }
  0x86   : > { %v5909_v56 = vld [vmem:[%s7009_s19 + $0x360] ss:$36 sps:$4 sm:$0xff]   ;;  %v5915_v60 = vld [vmem:[%s7009_s19 + $0x3a8] ss:$36 sps:$4 sm:$0xff]   ;;  %v5917_v62 = vld [vmem:[%s7009_s19 + $0x3f4] ss:$36 sps:$4 sm:$0xff]  }
  0x87   : > { %3968 = vmatpush1.bf16.msra.mxu0 %v5861_v20  ;;  %3991 = vmatprep.mubr.bf16.mxu0 %v7073_v49  ;;  %v5910_v57 = vld [vmem:[%s7009_s19 + $0x7e0] ss:$36 sps:$4 sm:$0xff]   ;;  %v5916_v61 = vld [vmem:[%s7009_s19 + $0x828] ss:$36 sps:$4 sm:$0xff]   ;;  %v5919_v63 = vld [vmem:[%s7009_s19 + $0x874] ss:$36 sps:$4 sm:$0xff]  }
  0x88   : > { %4009 = vmatpush1.bf16.msra.mxu1 %v5862_v21  ;;  %3969 = vmatprep.subr.bf16.mxu0 %v5863_v22  ;;  %v5921_v0 = vld [vmem:[%s7009_s19 + $0x3f0] ss:$36 sps:$4 sm:$0xff]   ;;  %v5923_v2 = vld [vmem:[%s7009_s19 + $0x43c] ss:$36 sps:$4 sm:$0xff]   ;;  %v5935_v6 = vld [vmem:[%s7009_s19 + $0x904] ss:$36 sps:$4 sm:$0xff]  }
  0x89   : > { %4010 = vmatprep.subr.bf16.mxu1 %v5865_v23  ;;  %v5922_v1 = vld [vmem:[%s7009_s19 + $0x870] ss:$36 sps:$4 sm:$0xff]   ;;  %v5925_v3 = vld [vmem:[%s7009_s19 + $0x8bc] ss:$36 sps:$4 sm:$0xff]   ;;  %v5938_v7 = vld [vmem:[%s7009_s19 + $0xd84] ss:$36 sps:$4 sm:$0xff]  }
  0x8a   : > { %v5927_v4 = vld [vmem:[%s7009_s19 + $0x438] ss:$36 sps:$4 sm:$0xff]   ;;  %v5933_v10 = vld [vmem:[%s7009_s19 + $0x900] ss:$36 sps:$4 sm:$0xff]   ;;  %v5941_v12 = vld [vmem:[%s7009_s19 + $0x94c] ss:$36 sps:$4 sm:$0xff]  }
  0x8b   : > { %3970 = vmatpush1.bf16.msra.mxu0 %v5867_v24  ;;  %v5928_v5 = vld [vmem:[%s7009_s19 + $0x8b8] ss:$36 sps:$4 sm:$0xff]   ;;  %v5936_v11 = vld [vmem:[%s7009_s19 + $0xd80] ss:$36 sps:$4 sm:$0xff]   ;;  %v5944_v13 = vld [vmem:[%s7009_s19 + $0xdcc] ss:$36 sps:$4 sm:$0xff]  }
  0x8c   : > { %4011 = vmatpush1.bf16.msra.mxu1 %v5868_v25  ;;  %3971 = vmatprep.subr.bf16.mxu0 %v5869_v26  ;;  %v5939_v14 = vld [vmem:[%s7009_s19 + $0x948] ss:$36 sps:$4 sm:$0xff]   ;;  %v5947_v16 = vld [vmem:[%s7009_s19 + $0x994] ss:$36 sps:$4 sm:$0xff]   ;;  %v5953_v20 = vld [vmem:[%s7009_s19 + $0x9dc] ss:$36 sps:$4 sm:$0xff]  }
  0x8d   : > { %4012 = vmatprep.subr.bf16.mxu1 %v5871_v27  ;;  %v5942_v15 = vld [vmem:[%s7009_s19 + $0xdc8] ss:$36 sps:$4 sm:$0xff]   ;;  %v5950_v17 = vld [vmem:[%s7009_s19 + $0xe14] ss:$36 sps:$4 sm:$0xff]   ;;  %v5956_v21 = vld [vmem:[%s7009_s19 + $0xe5c] ss:$36 sps:$4 sm:$0xff]  }
  0x8e   : > { %v5945_v18 = vld [vmem:[%s7009_s19 + $0x990] ss:$36 sps:$4 sm:$0xff]   ;;  %v5951_v22 = vld [vmem:[%s7009_s19 + $0x9d8] ss:$36 sps:$4 sm:$0xff]   ;;  %v5959_v24 = vld [vmem:[%s7009_s19 + $0xa24] ss:$36 sps:$4 sm:$0xff]  }
  0x8f   : > { %3972 = vmatpush1.bf16.msra.mxu0 %v5873_v28  ;;  %v5948_v19 = vld [vmem:[%s7009_s19 + $0xe10] ss:$36 sps:$4 sm:$0xff]   ;;  %v5954_v23 = vld [vmem:[%s7009_s19 + $0xe58] ss:$36 sps:$4 sm:$0xff]   ;;  %v5962_v25 = vld [vmem:[%s7009_s19 + $0xea4] ss:$36 sps:$4 sm:$0xff]  }
  0x90   : > { %4013 = vmatpush1.bf16.msra.mxu1 %v5874_v29  ;;  %3973 = vmatprep.subr.bf16.mxu0 %v5875_v30  ;;  %v5957_v26 = vld [vmem:[%s7009_s19 + $0xa20] ss:$36 sps:$4 sm:$0xff]   ;;  %v5965_v28 = vld [vmem:[%s7009_s19 + $0xa6c] ss:$36 sps:$4 sm:$0xff]  }
  0x91   : > { %4014 = vmatprep.subr.bf16.mxu1 %v5877_v31  ;;  %v5960_v27 = vld [vmem:[%s7009_s19 + $0xea0] ss:$36 sps:$4 sm:$0xff]   ;;  %v5968_v29 = vld [vmem:[%s7009_s19 + $0xeec] ss:$36 sps:$4 sm:$0xff]  }
  0x92   : > { %v5963_v30 = vld [vmem:[%s7009_s19 + $0xa68] ss:$36 sps:$4 sm:$0xff]  }
  0x93   : > { %3974 = vmatpush1.bf16.msra.mxu0 %v5879_v32  ;;  %v5966_v31 = vld [vmem:[%s7009_s19 + $0xee8] ss:$36 sps:$4 sm:$0xff]   ;;  %v5971_v32 = vld [vmem:[%s7009_s19 + $0xab4] ss:$36 sps:$4 sm:$0xff]  }
  0x94   : > { %4015 = vmatpush1.bf16.msra.mxu1 %v5880_v33  ;;  %3975 = vmatprep.subr.bf16.mxu0 %v5881_v34  ;;  %v5974_v33 = vld [vmem:[%s7009_s19 + $0xf34] ss:$36 sps:$4 sm:$0xff]   ;;  %v7131_v34 = vld [vmem:[%s7023_s16 + $0x10] sm:$0xff] }
  0x95   : > { %4016 = vmatprep.subr.bf16.mxu1 %v5883_v35  ;;  %v7134_v35 = vld [vmem:[%s7023_s16 + $0x18] sm:$0xff] }
  0x96   : > { %v5989_v48 = vld [vmem:[%s7009_s19 + $0xb8c] ss:$36 sps:$4 sm:$0xff]  }
  0x97   : > { %3976 = vmatpush1.bf16.msra.mxu0 %v5885_v36  ;;  %v5969_v36 = vld [vmem:[%s7009_s19 + $0xab0] ss:$36 sps:$4 sm:$0xff]  }
  0x98   : > { %4017 = vmatpush1.bf16.msra.mxu1 %v5886_v37  ;;  %3977 = vmatprep.subr.bf16.mxu0 %v5887_v38  ;;  %v5972_v37 = vld [vmem:[%s7009_s19 + $0xf30] ss:$36 sps:$4 sm:$0xff]   ;;  %v7140_v38 = vcombine.high %v7131_v34, %v7131_v34 }
  0x99   : > { %4018 = vmatprep.subr.bf16.mxu1 %v5889_v39  ;;  %v7144_v39 = vcombine.high %v7134_v35, %v7134_v35  ;;  %v5992_v50 = vld [vmem:[%s7009_s19 + $0x100c] ss:$36 sps:$4 sm:$0xff]  }
  0x9b   : > { %3978 = vmatpush1.bf16.msra.mxu0 %v5891_v40  ;;  %v5977_v40 = vld [vmem:[%s7009_s19 + $0xafc] ss:$36 sps:$4 sm:$0xff]  }
  0x9c   : > { %4019 = vmatpush1.bf16.msra.mxu1 %v5892_v41  ;;  %3979 = vmatprep.subr.bf16.mxu0 %v5893_v42  ;;  %v5980_v41 = vld [vmem:[%s7009_s19 + $0xf7c] ss:$36 sps:$4 sm:$0xff]  }
  0x9d   : > { %4020 = vmatprep.subr.bf16.mxu1 %v5895_v43  ;;  %v5975_v42 = vld [vmem:[%s7009_s19 + $0xaf8] ss:$36 sps:$4 sm:$0xff]  }
  0x9e   : > { %v5978_v43 = vld [vmem:[%s7009_s19 + $0xf78] ss:$36 sps:$4 sm:$0xff]  }
  0x9f   : > { %3980 = vmatpush1.bf16.msra.mxu0 %v5897_v44  ;;  %v5983_v44 = vld [vmem:[%s7009_s19 + $0xb44] ss:$36 sps:$4 sm:$0xff]  }
  0xa0   : > { %4021 = vmatpush1.bf16.msra.mxu1 %v5898_v45  ;;  %3981 = vmatprep.subr.bf16.mxu0 %v5899_v46  ;;  %v5986_v45 = vld [vmem:[%s7009_s19 + $0xfc4] ss:$36 sps:$4 sm:$0xff]  }
  0xa1   : > { %4022 = vmatprep.subr.bf16.mxu1 %v5901_v47  ;;  %v5981_v46 = vld [vmem:[%s7009_s19 + $0xb40] ss:$36 sps:$4 sm:$0xff]  }
  0xa2   : > { %v5984_v47 = vld [vmem:[%s7009_s19 + $0xfc0] ss:$36 sps:$4 sm:$0xff]  }
  0xa3   : > { %3982 = vmatpush1.bf16.msra.mxu0 %v5903_v51  ;;  %v5987_v51 = vld [vmem:[%s7009_s19 + $0xb88] ss:$36 sps:$4 sm:$0xff]  }
  0xa4   : > { %4023 = vmatpush1.bf16.msra.mxu1 %v5904_v52  ;;  %3983 = vmatprep.subr.bf16.mxu0 %v5905_v54  ;;  %v5990_v52 = vld [vmem:[%s7009_s19 + $0x1008] ss:$36 sps:$4 sm:$0xff]   ;;  %v5995_v54 = vld [vmem:[%s7009_s19 + $0xbd4] ss:$36 sps:$4 sm:$0xff]  }
  0xa5   : > { %4024 = vmatprep.subr.bf16.mxu1 %v5907_v55  ;;  %v5998_v55 = vld [vmem:[%s7009_s19 + $0x1054] ss:$36 sps:$4 sm:$0xff]  }
  0xa7   : > { %3984 = vmatpush1.bf16.msra.mxu0 %v5909_v56  ;;  %v5993_v56 = vld [vmem:[%s7009_s19 + $0xbd0] ss:$36 sps:$4 sm:$0xff]  }
  0xa8   : > { %4025 = vmatpush1.bf16.msra.mxu1 %v5910_v57  ;;  %3985 = vmatprep.subr.bf16.mxu0 %v5911_v58  ;;  %v5996_v57 = vld [vmem:[%s7009_s19 + $0x1050] ss:$36 sps:$4 sm:$0xff]   ;;  %v6001_v58 = vld [vmem:[%s7009_s19 + $0xc1c] ss:$36 sps:$4 sm:$0xff]  }
  0xa9   : > { %4026 = vmatprep.subr.bf16.mxu1 %v5913_v59  ;;  %v6004_v59 = vld [vmem:[%s7009_s19 + $0x109c] ss:$36 sps:$4 sm:$0xff]  }
  0xab   : > { %3986 = vmatpush1.bf16.msra.mxu0 %v5915_v60  ;;  %v5999_v60 = vld [vmem:[%s7009_s19 + $0xc18] ss:$36 sps:$4 sm:$0xff]  }
  0xac   : > { %4027 = vmatpush1.bf16.msra.mxu1 %v5916_v61  ;;  %3987 = vmatprep.subr.bf16.mxu0 %v5917_v62  ;;  %v6002_v61 = vld [vmem:[%s7009_s19 + $0x1098] ss:$36 sps:$4 sm:$0xff]   ;;  %v6007_v62 = vld [vmem:[%s7009_s19 + $0xc64] ss:$36 sps:$4 sm:$0xff]  }
  0xad   : > { %4028 = vmatprep.subr.bf16.mxu1 %v5919_v63  ;;  %v6010_v63 = vld [vmem:[%s7009_s19 + $0x10e4] ss:$36 sps:$4 sm:$0xff]  }
  0xaf   : > { %3988 = vmatpush1.bf16.msra.mxu0 %v5921_v0  ;;  %v6005_v0 = vld [vmem:[%s7009_s19 + $0xc60] ss:$36 sps:$4 sm:$0xff]  }
  0xb0   : > { %4029 = vmatpush1.bf16.msra.mxu1 %v5922_v1  ;;  %3989 = vmatprep.subr.bf16.mxu0 %v5923_v2  ;;  %v6008_v1 = vld [vmem:[%s7009_s19 + $0x10e0] ss:$36 sps:$4 sm:$0xff]   ;;  %v6013_v2 = vld [vmem:[%s7009_s19 + $0xcac] ss:$36 sps:$4 sm:$0xff]  }
  0xb1   : > { %4030 = vmatprep.subr.bf16.mxu1 %v5925_v3  ;;  %v6016_v3 = vld [vmem:[%s7009_s19 + $0x112c] ss:$36 sps:$4 sm:$0xff]  }
  0xb3   : > { %3990 = vmatpush1.bf16.msra.mxu0 %v5927_v4  ;;  %v6011_v4 = vld [vmem:[%s7009_s19 + $0xca8] ss:$36 sps:$4 sm:$0xff]  }
  0xb4   : > { %4031 = vmatpush1.bf16.msra.mxu1 %v5928_v5  ;;  %4041 = vmatprep.subr.bf16.mxu0 %v5935_v6  ;;  %v6014_v5 = vld [vmem:[%s7009_s19 + $0x1128] ss:$36 sps:$4 sm:$0xff]   ;;  %v6019_v6 = vld [vmem:[%s7009_s19 + $0xcf4] ss:$36 sps:$4 sm:$0xff]  }
  0xb5   : > { %4082 = vmatprep.subr.bf16.mxu1 %v5938_v7  ;;  %v6022_v7 = vld [vmem:[%s7009_s19 + $0x1174] ss:$36 sps:$4 sm:$0xff]  }
  0xb6   : > { %3992 = vmatmul.mubr.bf16.vlgmr.msra.gmra.mrb[0].mxu0 %v7100_v8 }
  0xb7   : > { %4033 = vmatmul.mubr.bf16.vlgmr.msra.gmra.mrb[0].mxu1 %v7102_v9  ;;  %4042 = vmatpush1.bf16.msra.mxu0 %v5933_v10  ;;  %v6017_v10 = vld [vmem:[%s7009_s19 + $0xcf0] ss:$36 sps:$4 sm:$0xff]  }
  0xb8   : > { %4083 = vmatpush1.bf16.msra.mxu1 %v5936_v11  ;;  %4043 = vmatprep.subr.bf16.mxu0 %v5941_v12  ;;  %v6020_v11 = vld [vmem:[%s7009_s19 + $0x1170] ss:$36 sps:$4 sm:$0xff]   ;;  %v6025_v12 = vld [vmem:[%s7009_s19 + $0xd3c] ss:$36 sps:$4 sm:$0xff]  }
  0xb9   : > { %4084 = vmatprep.subr.bf16.mxu1 %v5944_v13  ;;  %4073 = vmatprep.mubr.bf16.mxu0 %v7140_v38  ;;  %v6028_v13 = vld [vmem:[%s7009_s19 + $0x11bc] ss:$36 sps:$4 sm:$0xff]  }
  0xba   : > { %4114 = vmatprep.mubr.bf16.mxu1 %v7144_v39 }
  0xbb   : > { %4044 = vmatpush1.bf16.msra.mxu0 %v5939_v14  ;;  %v6023_v14 = vld [vmem:[%s7009_s19 + $0xd38] ss:$36 sps:$4 sm:$0xff]  }
  0xbc   : > { %4085 = vmatpush1.bf16.msra.mxu1 %v5942_v15  ;;  %4045 = vmatprep.subr.bf16.mxu0 %v5947_v16  ;;  %v6026_v15 = vld [vmem:[%s7009_s19 + $0x11b8] ss:$36 sps:$4 sm:$0xff]   ;;  %v6035_v16 = vld [vmem:[%s7009_s19 + $0xc] ss:$36 sps:$4 sm:$0xff]  }
  0xbd   : > { %4086 = vmatprep.subr.bf16.mxu1 %v5950_v17  ;;  %v6038_v17 = vld [vmem:[%s7009_s19 + $0x48c] ss:$36 sps:$4 sm:$0xff]  }
  0xbf   : > { %4046 = vmatpush1.bf16.msra.mxu0 %v5945_v18  ;;  %v7188_v18 = vcombine.low %v7131_v34, %v7131_v34  ;;  %v6059_v34 = vld [vmem:[%s7009_s19 + $0x12c] ss:$36 sps:$4 sm:$0xff]  }
  0xc0   : > { %4087 = vmatpush1.bf16.msra.mxu1 %v5948_v19  ;;  %4047 = vmatprep.subr.bf16.mxu0 %v5953_v20  ;;  %v7192_v19 = vcombine.low %v7134_v35, %v7134_v35  ;;  %v6033_v20 = vld [vmem:[%s7009_s19 + $0x8] ss:$36 sps:$4 sm:$0xff]  }
  0xc1   : > { %4088 = vmatprep.subr.bf16.mxu1 %v5956_v21  ;;  %v6036_v21 = vld [vmem:[%s7009_s19 + $0x488] ss:$36 sps:$4 sm:$0xff]  }
  0xc2   : > { %v6062_v35 = vld [vmem:[%s7009_s19 + $0x5ac] ss:$36 sps:$4 sm:$0xff]  }
  0xc3   : > { %4048 = vmatpush1.bf16.msra.mxu0 %v5951_v22  ;;  %v6041_v22 = vld [vmem:[%s7009_s19 + $0x54] ss:$36 sps:$4 sm:$0xff]  }
  0xc4   : > { %4089 = vmatpush1.bf16.msra.mxu1 %v5954_v23  ;;  %4049 = vmatprep.subr.bf16.mxu0 %v5959_v24  ;;  %v6044_v23 = vld [vmem:[%s7009_s19 + $0x4d4] ss:$36 sps:$4 sm:$0xff]  }
  0xc5   : > { %4090 = vmatprep.subr.bf16.mxu1 %v5962_v25  ;;  %v6039_v24 = vld [vmem:[%s7009_s19 + $0x50] ss:$36 sps:$4 sm:$0xff]  }
  0xc6   : > { %v6042_v25 = vld [vmem:[%s7009_s19 + $0x4d0] ss:$36 sps:$4 sm:$0xff]  }
  0xc7   : > { %4050 = vmatpush1.bf16.msra.mxu0 %v5957_v26  ;;  %v6047_v26 = vld [vmem:[%s7009_s19 + $0x9c] ss:$36 sps:$4 sm:$0xff]  }
  0xc8   : > { %4091 = vmatpush1.bf16.msra.mxu1 %v5960_v27  ;;  %4051 = vmatprep.subr.bf16.mxu0 %v5965_v28  ;;  %v6050_v27 = vld [vmem:[%s7009_s19 + $0x51c] ss:$36 sps:$4 sm:$0xff]  }
  0xc9   : > { %4092 = vmatprep.subr.bf16.mxu1 %v5968_v29  ;;  %v6045_v28 = vld [vmem:[%s7009_s19 + $0x98] ss:$36 sps:$4 sm:$0xff]  }
  0xca   : > { %v6048_v29 = vld [vmem:[%s7009_s19 + $0x518] ss:$36 sps:$4 sm:$0xff]  }
  0xcb   : > { %4052 = vmatpush1.bf16.msra.mxu0 %v5963_v30  ;;  %v6053_v30 = vld [vmem:[%s7009_s19 + $0xe4] ss:$36 sps:$4 sm:$0xff]  }
  0xcc   : > { %4093 = vmatpush1.bf16.msra.mxu1 %v5966_v31  ;;  %4053 = vmatprep.subr.bf16.mxu0 %v5971_v32  ;;  %v6056_v31 = vld [vmem:[%s7009_s19 + $0x564] ss:$36 sps:$4 sm:$0xff]  }
  0xcd   : > { %4094 = vmatprep.subr.bf16.mxu1 %v5974_v33  ;;  %v6051_v32 = vld [vmem:[%s7009_s19 + $0xe0] ss:$36 sps:$4 sm:$0xff]  }
  0xce   : > { %v6054_v33 = vld [vmem:[%s7009_s19 + $0x560] ss:$36 sps:$4 sm:$0xff]  }
  0xcf   : > { %4054 = vmatpush1.bf16.msra.mxu0 %v5969_v36  ;;  %v6057_v36 = vld [vmem:[%s7009_s19 + $0x128] ss:$36 sps:$4 sm:$0xff]  }
  0xd0   : > { %4095 = vmatpush1.bf16.msra.mxu1 %v5972_v37  ;;  %4055 = vmatprep.subr.bf16.mxu0 %v5977_v40  ;;  %v6060_v37 = vld [vmem:[%s7009_s19 + $0x5a8] ss:$36 sps:$4 sm:$0xff]   ;;  %v6065_v40 = vld [vmem:[%s7009_s19 + $0x174] ss:$36 sps:$4 sm:$0xff]  }
  0xd1   : > { %4096 = vmatprep.subr.bf16.mxu1 %v5980_v41  ;;  %v6068_v41 = vld [vmem:[%s7009_s19 + $0x5f4] ss:$36 sps:$4 sm:$0xff]  }
  0xd3   : > { %4056 = vmatpush1.bf16.msra.mxu0 %v5975_v42  ;;  %v6063_v42 = vld [vmem:[%s7009_s19 + $0x170] ss:$36 sps:$4 sm:$0xff]  }
  0xd4   : > { %4097 = vmatpush1.bf16.msra.mxu1 %v5978_v43  ;;  %4057 = vmatprep.subr.bf16.mxu0 %v5983_v44  ;;  %v6066_v43 = vld [vmem:[%s7009_s19 + $0x5f0] ss:$36 sps:$4 sm:$0xff]   ;;  %v6071_v44 = vld [vmem:[%s7009_s19 + $0x1bc] ss:$36 sps:$4 sm:$0xff]  }
  0xd5   : > { %4098 = vmatprep.subr.bf16.mxu1 %v5986_v45  ;;  %v6074_v45 = vld [vmem:[%s7009_s19 + $0x63c] ss:$36 sps:$4 sm:$0xff]  }
  0xd7   : > { %4058 = vmatpush1.bf16.msra.mxu0 %v5981_v46  ;;  %v6069_v46 = vld [vmem:[%s7009_s19 + $0x1b8] ss:$36 sps:$4 sm:$0xff]  }
  0xd8   : > { %4099 = vmatpush1.bf16.msra.mxu1 %v5984_v47  ;;  %4059 = vmatprep.subr.bf16.mxu0 %v5989_v48  ;;  %v6072_v47 = vld [vmem:[%s7009_s19 + $0x638] ss:$36 sps:$4 sm:$0xff]   ;;  %v6077_v48 = vld [vmem:[%s7009_s19 + $0x204] ss:$36 sps:$4 sm:$0xff]  }
  0xd9   : > { %4100 = vmatprep.subr.bf16.mxu1 %v5992_v50  ;;  %v6080_v50 = vld [vmem:[%s7009_s19 + $0x684] ss:$36 sps:$4 sm:$0xff]  }
  0xdb   : > { %4060 = vmatpush1.bf16.msra.mxu0 %v5987_v51  ;;  %v6075_v51 = vld [vmem:[%s7009_s19 + $0x200] ss:$36 sps:$4 sm:$0xff]  }
  0xdc   : > { %4101 = vmatpush1.bf16.msra.mxu1 %v5990_v52  ;;  %4061 = vmatprep.subr.bf16.mxu0 %v5995_v54  ;;  %v6078_v52 = vld [vmem:[%s7009_s19 + $0x680] ss:$36 sps:$4 sm:$0xff]   ;;  %v6083_v54 = vld [vmem:[%s7009_s19 + $0x24c] ss:$36 sps:$4 sm:$0xff]  }
  0xdd   : > { %4102 = vmatprep.subr.bf16.mxu1 %v5998_v55  ;;  %v6086_v55 = vld [vmem:[%s7009_s19 + $0x6cc] ss:$36 sps:$4 sm:$0xff]  }
  0xdf   : > { %4062 = vmatpush1.bf16.msra.mxu0 %v5993_v56  ;;  %v6081_v56 = vld [vmem:[%s7009_s19 + $0x248] ss:$36 sps:$4 sm:$0xff]  }
  0xe0   : > { %4103 = vmatpush1.bf16.msra.mxu1 %v5996_v57  ;;  %4063 = vmatprep.subr.bf16.mxu0 %v6001_v58  ;;  %v6084_v57 = vld [vmem:[%s7009_s19 + $0x6c8] ss:$36 sps:$4 sm:$0xff]   ;;  %v6089_v58 = vld [vmem:[%s7009_s19 + $0x294] ss:$36 sps:$4 sm:$0xff]  }
  0xe1   : > { %4104 = vmatprep.subr.bf16.mxu1 %v6004_v59  ;;  %v6092_v59 = vld [vmem:[%s7009_s19 + $0x714] ss:$36 sps:$4 sm:$0xff]  }
  0xe3   : > { %4064 = vmatpush1.bf16.msra.mxu0 %v5999_v60  ;;  %v6087_v60 = vld [vmem:[%s7009_s19 + $0x290] ss:$36 sps:$4 sm:$0xff]  }
  0xe4   : > { %4105 = vmatpush1.bf16.msra.mxu1 %v6002_v61  ;;  %4065 = vmatprep.subr.bf16.mxu0 %v6007_v62  ;;  %v6090_v61 = vld [vmem:[%s7009_s19 + $0x710] ss:$36 sps:$4 sm:$0xff]   ;;  %v6095_v62 = vld [vmem:[%s7009_s19 + $0x2dc] ss:$36 sps:$4 sm:$0xff]  }
  0xe5   : > { %4106 = vmatprep.subr.bf16.mxu1 %v6010_v63  ;;  %v6098_v63 = vld [vmem:[%s7009_s19 + $0x75c] ss:$36 sps:$4 sm:$0xff]  }
  0xe7   : > { %4066 = vmatpush1.bf16.msra.mxu0 %v6005_v0  ;;  %v6093_v0 = vld [vmem:[%s7009_s19 + $0x2d8] ss:$36 sps:$4 sm:$0xff]  }
  0xe8   : > { %4107 = vmatpush1.bf16.msra.mxu1 %v6008_v1  ;;  %4067 = vmatprep.subr.bf16.mxu0 %v6013_v2  ;;  %v6096_v1 = vld [vmem:[%s7009_s19 + $0x758] ss:$36 sps:$4 sm:$0xff]   ;;  %v6101_v2 = vld [vmem:[%s7009_s19 + $0x324] ss:$36 sps:$4 sm:$0xff]  }
  0xe9   : > { %4108 = vmatprep.subr.bf16.mxu1 %v6016_v3  ;;  %v6104_v3 = vld [vmem:[%s7009_s19 + $0x7a4] ss:$36 sps:$4 sm:$0xff]  }
  0xeb   : > { %4068 = vmatpush1.bf16.msra.mxu0 %v6011_v4  ;;  %v6099_v4 = vld [vmem:[%s7009_s19 + $0x320] ss:$36 sps:$4 sm:$0xff]  }
  0xec   : > { %4109 = vmatpush1.bf16.msra.mxu1 %v6014_v5  ;;  %4069 = vmatprep.subr.bf16.mxu0 %v6019_v6  ;;  %v6102_v5 = vld [vmem:[%s7009_s19 + $0x7a0] ss:$36 sps:$4 sm:$0xff]   ;;  %v6107_v6 = vld [vmem:[%s7009_s19 + $0x36c] ss:$36 sps:$4 sm:$0xff]  }
  0xed   : > { %4110 = vmatprep.subr.bf16.mxu1 %v6022_v7  ;;  %v6110_v7 = vld [vmem:[%s7009_s19 + $0x7ec] ss:$36 sps:$4 sm:$0xff]  }
  0xef   : > { %4070 = vmatpush1.bf16.msra.mxu0 %v6017_v10  ;;  %v6105_v10 = vld [vmem:[%s7009_s19 + $0x368] ss:$36 sps:$4 sm:$0xff]  }
  0xf0   : > { %4111 = vmatpush1.bf16.msra.mxu1 %v6020_v11  ;;  %4071 = vmatprep.subr.bf16.mxu0 %v6025_v12  ;;  %v6108_v11 = vld [vmem:[%s7009_s19 + $0x7e8] ss:$36 sps:$4 sm:$0xff]   ;;  %v6113_v12 = vld [vmem:[%s7009_s19 + $0x3b4] ss:$36 sps:$4 sm:$0xff]  }
  0xf1   : > { %4112 = vmatprep.subr.bf16.mxu1 %v6028_v13  ;;  %v6116_v13 = vld [vmem:[%s7009_s19 + $0x834] ss:$36 sps:$4 sm:$0xff]  }
  0xf3   : > { %4072 = vmatpush1.bf16.msra.mxu0 %v6023_v14  ;;  %v6111_v14 = vld [vmem:[%s7009_s19 + $0x3b0] ss:$36 sps:$4 sm:$0xff]  }
  0xf4   : > { %4113 = vmatpush1.bf16.msra.mxu1 %v6026_v15  ;;  %4123 = vmatprep.subr.bf16.mxu0 %v6035_v16  ;;  %v6114_v15 = vld [vmem:[%s7009_s19 + $0x830] ss:$36 sps:$4 sm:$0xff]   ;;  %v6119_v16 = vld [vmem:[%s7009_s19 + $0x3fc] ss:$36 sps:$4 sm:$0xff]  }
  0xf5   : > { %4164 = vmatprep.subr.bf16.mxu1 %v6038_v17  ;;  %v6122_v17 = vld [vmem:[%s7009_s19 + $0x87c] ss:$36 sps:$4 sm:$0xff]  }
  0xf6   : > { %4074 = vmatmul.mubr.bf16.vlgmr.msra.gmra.mrb[4].mxu0 %v7188_v18 }
  0xf7   : > { %4115 = vmatmul.mubr.bf16.vlgmr.msra.gmra.mrb[4].mxu1 %v7192_v19  ;;  %4124 = vmatpush1.bf16.msra.mxu0 %v6033_v20  ;;  %v6117_v20 = vld [vmem:[%s7009_s19 + $0x3f8] ss:$36 sps:$4 sm:$0xff]  }
  0xf8   : > { %4165 = vmatpush1.bf16.msra.mxu1 %v6036_v21  ;;  %4125 = vmatprep.subr.bf16.mxu0 %v6041_v22  ;;  %v6120_v21 = vld [vmem:[%s7009_s19 + $0x878] ss:$36 sps:$4 sm:$0xff]   ;;  %v6125_v22 = vld [vmem:[%s7009_s19 + $0x444] ss:$36 sps:$4 sm:$0xff]  }
  0xf9   : > { %4166 = vmatprep.subr.bf16.mxu1 %v6044_v23  ;;  %4155 = vmatprep.mubr.bf16.mxu0 %v7073_v49  ;;  %v6128_v23 = vld [vmem:[%s7009_s19 + $0x8c4] ss:$36 sps:$4 sm:$0xff]  }
  0xfa   : > { %4196 = vmatprep.mubr.bf16.mxu1 %v7078_v53 }
  0xfb   : > { %4126 = vmatpush1.bf16.msra.mxu0 %v6039_v24  ;;  %v6123_v24 = vld [vmem:[%s7009_s19 + $0x440] ss:$36 sps:$4 sm:$0xff]  }
  0xfc   : > { %4167 = vmatpush1.bf16.msra.mxu1 %v6042_v25  ;;  %4127 = vmatprep.subr.bf16.mxu0 %v6047_v26  ;;  %v6126_v25 = vld [vmem:[%s7009_s19 + $0x8c0] ss:$36 sps:$4 sm:$0xff]   ;;  %v6131_v26 = vld [vmem:[%s7009_s19 + $0x90c] ss:$36 sps:$4 sm:$0xff]  }
  0xfd   : > { %4168 = vmatprep.subr.bf16.mxu1 %v6050_v27  ;;  %v6134_v27 = vld [vmem:[%s7009_s19 + $0xd8c] ss:$36 sps:$4 sm:$0xff]  }
  0xff   : > { %4128 = vmatpush1.bf16.msra.mxu0 %v6045_v28  ;;  %v6129_v28 = vld [vmem:[%s7009_s19 + $0x908] ss:$36 sps:$4 sm:$0xff]  }
 0x100   : > { %4169 = vmatpush1.bf16.msra.mxu1 %v6048_v29  ;;  %4129 = vmatprep.subr.bf16.mxu0 %v6053_v30  ;;  %v6132_v29 = vld [vmem:[%s7009_s19 + $0xd88] ss:$36 sps:$4 sm:$0xff]   ;;  %v6137_v30 = vld [vmem:[%s7009_s19 + $0x954] ss:$36 sps:$4 sm:$0xff]  }
 0x101   : > { %4170 = vmatprep.subr.bf16.mxu1 %v6056_v31  ;;  %v6140_v31 = vld [vmem:[%s7009_s19 + $0xdd4] ss:$36 sps:$4 sm:$0xff]  }
 0x103   : > { %4130 = vmatpush1.bf16.msra.mxu0 %v6051_v32  ;;  %v6135_v32 = vld [vmem:[%s7009_s19 + $0x950] ss:$36 sps:$4 sm:$0xff]  }
 0x104   : > { %4171 = vmatpush1.bf16.msra.mxu1 %v6054_v33  ;;  %4131 = vmatprep.subr.bf16.mxu0 %v6059_v34  ;;  %v6138_v33 = vld [vmem:[%s7009_s19 + $0xdd0] ss:$36 sps:$4 sm:$0xff]   ;;  %v6143_v34 = vld [vmem:[%s7009_s19 + $0x99c] ss:$36 sps:$4 sm:$0xff]  }
 0x105   : > { %4172 = vmatprep.subr.bf16.mxu1 %v6062_v35  ;;  %v6146_v35 = vld [vmem:[%s7009_s19 + $0xe1c] ss:$36 sps:$4 sm:$0xff]  }
 0x107   : > { %4132 = vmatpush1.bf16.msra.mxu0 %v6057_v36  ;;  %v6141_v36 = vld [vmem:[%s7009_s19 + $0x998] ss:$36 sps:$4 sm:$0xff]  }
 0x108   : > { %4173 = vmatpush1.bf16.msra.mxu1 %v6060_v37  ;;  %4133 = vmatprep.subr.bf16.mxu0 %v6065_v40  ;;  %v6144_v37 = vld [vmem:[%s7009_s19 + $0xe18] ss:$36 sps:$4 sm:$0xff]   ;;  %v6149_v40 = vld [vmem:[%s7009_s19 + $0x9e4] ss:$36 sps:$4 sm:$0xff]  }
 0x109   : > { %4174 = vmatprep.subr.bf16.mxu1 %v6068_v41  ;;  %v6152_v41 = vld [vmem:[%s7009_s19 + $0xe64] ss:$36 sps:$4 sm:$0xff]  }
 0x10b   : > { %4134 = vmatpush1.bf16.msra.mxu0 %v6063_v42  ;;  %v6147_v42 = vld [vmem:[%s7009_s19 + $0x9e0] ss:$36 sps:$4 sm:$0xff]  }
 0x10c   : > { %4175 = vmatpush1.bf16.msra.mxu1 %v6066_v43  ;;  %4135 = vmatprep.subr.bf16.mxu0 %v6071_v44  ;;  %v6150_v43 = vld [vmem:[%s7009_s19 + $0xe60] ss:$36 sps:$4 sm:$0xff]   ;;  %v6155_v44 = vld [vmem:[%s7009_s19 + $0xa2c] ss:$36 sps:$4 sm:$0xff]  }
 0x10d   : > { %4176 = vmatprep.subr.bf16.mxu1 %v6074_v45  ;;  %v6158_v45 = vld [vmem:[%s7009_s19 + $0xeac] ss:$36 sps:$4 sm:$0xff]  }
 0x10f   : > { %4136 = vmatpush1.bf16.msra.mxu0 %v6069_v46  ;;  %v6153_v46 = vld [vmem:[%s7009_s19 + $0xa28] ss:$36 sps:$4 sm:$0xff]  }
 0x110   : > { %4177 = vmatpush1.bf16.msra.mxu1 %v6072_v47  ;;  %4137 = vmatprep.subr.bf16.mxu0 %v6077_v48  ;;  %v6156_v47 = vld [vmem:[%s7009_s19 + $0xea8] ss:$36 sps:$4 sm:$0xff]   ;;  %v6161_v48 = vld [vmem:[%s7009_s19 + $0xa74] ss:$36 sps:$4 sm:$0xff]  }
 0x111   : > { %4178 = vmatprep.subr.bf16.mxu1 %v6080_v50  ;;  %v6164_v50 = vld [vmem:[%s7009_s19 + $0xef4] ss:$36 sps:$4 sm:$0xff]  }
 0x113   : > { %4138 = vmatpush1.bf16.msra.mxu0 %v6075_v51  ;;  %v6159_v51 = vld [vmem:[%s7009_s19 + $0xa70] ss:$36 sps:$4 sm:$0xff]  }
 0x114   : > { %4179 = vmatpush1.bf16.msra.mxu1 %v6078_v52  ;;  %4139 = vmatprep.subr.bf16.mxu0 %v6083_v54  ;;  %v6162_v52 = vld [vmem:[%s7009_s19 + $0xef0] ss:$36 sps:$4 sm:$0xff]   ;;  %v6167_v54 = vld [vmem:[%s7009_s19 + $0xabc] ss:$36 sps:$4 sm:$0xff]  }
 0x115   : > { %4180 = vmatprep.subr.bf16.mxu1 %v6086_v55  ;;  %v6170_v55 = vld [vmem:[%s7009_s19 + $0xf3c] ss:$36 sps:$4 sm:$0xff]  }
 0x117   : > { %4140 = vmatpush1.bf16.msra.mxu0 %v6081_v56  ;;  %v6165_v56 = vld [vmem:[%s7009_s19 + $0xab8] ss:$36 sps:$4 sm:$0xff]  }
 0x118   : > { %4181 = vmatpush1.bf16.msra.mxu1 %v6084_v57  ;;  %4141 = vmatprep.subr.bf16.mxu0 %v6089_v58  ;;  %v6168_v57 = vld [vmem:[%s7009_s19 + $0xf38] ss:$36 sps:$4 sm:$0xff]   ;;  %v6173_v58 = vld [vmem:[%s7009_s19 + $0xb04] ss:$36 sps:$4 sm:$0xff]  }
 0x119   : > { %4182 = vmatprep.subr.bf16.mxu1 %v6092_v59  ;;  %v6176_v59 = vld [vmem:[%s7009_s19 + $0xf84] ss:$36 sps:$4 sm:$0xff]  }
 0x11b   : > { %4142 = vmatpush1.bf16.msra.mxu0 %v6087_v60  ;;  %v6171_v60 = vld [vmem:[%s7009_s19 + $0xb00] ss:$36 sps:$4 sm:$0xff]  }
 0x11c   : > { %4183 = vmatpush1.bf16.msra.mxu1 %v6090_v61  ;;  %4143 = vmatprep.subr.bf16.mxu0 %v6095_v62  ;;  %v6174_v61 = vld [vmem:[%s7009_s19 + $0xf80] ss:$36 sps:$4 sm:$0xff]   ;;  %v6179_v62 = vld [vmem:[%s7009_s19 + $0xb4c] ss:$36 sps:$4 sm:$0xff]  }
 0x11d   : > { %4184 = vmatprep.subr.bf16.mxu1 %v6098_v63  ;;  %v6182_v63 = vld [vmem:[%s7009_s19 + $0xfcc] ss:$36 sps:$4 sm:$0xff]  }
 0x11f   : > { %4144 = vmatpush1.bf16.msra.mxu0 %v6093_v0  ;;  %v6177_v0 = vld [vmem:[%s7009_s19 + $0xb48] ss:$36 sps:$4 sm:$0xff]  }
 0x120   : > { %4185 = vmatpush1.bf16.msra.mxu1 %v6096_v1  ;;  %4145 = vmatprep.subr.bf16.mxu0 %v6101_v2  ;;  %v6180_v1 = vld [vmem:[%s7009_s19 + $0xfc8] ss:$36 sps:$4 sm:$0xff]   ;;  %v6185_v2 = vld [vmem:[%s7009_s19 + $0xb94] ss:$36 sps:$4 sm:$0xff]  }
 0x121   : > { %4186 = vmatprep.subr.bf16.mxu1 %v6104_v3  ;;  %v6188_v3 = vld [vmem:[%s7009_s19 + $0x1014] ss:$36 sps:$4 sm:$0xff]  }
 0x123   : > { %4146 = vmatpush1.bf16.msra.mxu0 %v6099_v4  ;;  %v6183_v4 = vld [vmem:[%s7009_s19 + $0xb90] ss:$36 sps:$4 sm:$0xff]  }
 0x124   : > { %4187 = vmatpush1.bf16.msra.mxu1 %v6102_v5  ;;  %4147 = vmatprep.subr.bf16.mxu0 %v6107_v6  ;;  %v6186_v5 = vld [vmem:[%s7009_s19 + $0x1010] ss:$36 sps:$4 sm:$0xff]   ;;  %v6191_v6 = vld [vmem:[%s7009_s19 + $0xbdc] ss:$36 sps:$4 sm:$0xff]  }
 0x125   : > { %4188 = vmatprep.subr.bf16.mxu1 %v6110_v7  ;;  %v6194_v7 = vld [vmem:[%s7009_s19 + $0x105c] ss:$36 sps:$4 sm:$0xff]  }
 0x127   : > { %4148 = vmatpush1.bf16.msra.mxu0 %v6105_v10  ;;  %v6189_v10 = vld [vmem:[%s7009_s19 + $0xbd8] ss:$36 sps:$4 sm:$0xff]  }
 0x128   : > { %4189 = vmatpush1.bf16.msra.mxu1 %v6108_v11  ;;  %4149 = vmatprep.subr.bf16.mxu0 %v6113_v12  ;;  %v6192_v11 = vld [vmem:[%s7009_s19 + $0x1058] ss:$36 sps:$4 sm:$0xff]   ;;  %v6197_v12 = vld [vmem:[%s7009_s19 + $0xc24] ss:$36 sps:$4 sm:$0xff]  }
 0x129   : > { %4190 = vmatprep.subr.bf16.mxu1 %v6116_v13  ;;  %v6200_v13 = vld [vmem:[%s7009_s19 + $0x10a4] ss:$36 sps:$4 sm:$0xff]  }
 0x12b   : > { %4150 = vmatpush1.bf16.msra.mxu0 %v6111_v14  ;;  %v6195_v14 = vld [vmem:[%s7009_s19 + $0xc20] ss:$36 sps:$4 sm:$0xff]  }
 0x12c   : > { %4191 = vmatpush1.bf16.msra.mxu1 %v6114_v15  ;;  %4151 = vmatprep.subr.bf16.mxu0 %v6119_v16  ;;  %v6198_v15 = vld [vmem:[%s7009_s19 + $0x10a0] ss:$36 sps:$4 sm:$0xff]   ;;  %v6203_v16 = vld [vmem:[%s7009_s19 + $0xc6c] ss:$36 sps:$4 sm:$0xff]  }
 0x12d   : > { %4192 = vmatprep.subr.bf16.mxu1 %v6122_v17  ;;  %v6206_v17 = vld [vmem:[%s7009_s19 + $0x10ec] ss:$36 sps:$4 sm:$0xff]  }
 0x12f   : > { %4152 = vmatpush1.bf16.msra.mxu0 %v6117_v20  ;;  %v6201_v20 = vld [vmem:[%s7009_s19 + $0xc68] ss:$36 sps:$4 sm:$0xff]  }
 0x130   : > { %4193 = vmatpush1.bf16.msra.mxu1 %v6120_v21  ;;  %4153 = vmatprep.subr.bf16.mxu0 %v6125_v22  ;;  %v6204_v21 = vld [vmem:[%s7009_s19 + $0x10e8] ss:$36 sps:$4 sm:$0xff]   ;;  %v6209_v22 = vld [vmem:[%s7009_s19 + $0xcb4] ss:$36 sps:$4 sm:$0xff]  }
 0x131   : > { %4194 = vmatprep.subr.bf16.mxu1 %v6128_v23  ;;  %v6212_v23 = vld [vmem:[%s7009_s19 + $0x1134] ss:$36 sps:$4 sm:$0xff]  }
 0x133   : > { %4154 = vmatpush1.bf16.msra.mxu0 %v6123_v24  ;;  %v6207_v24 = vld [vmem:[%s7009_s19 + $0xcb0] ss:$36 sps:$4 sm:$0xff]  }
 0x134   : > { %4195 = vmatpush1.bf16.msra.mxu1 %v6126_v25  ;;  %4205 = vmatprep.subr.bf16.mxu0 %v6131_v26  ;;  %v6210_v25 = vld [vmem:[%s7009_s19 + $0x1130] ss:$36 sps:$4 sm:$0xff]   ;;  %v6215_v26 = vld [vmem:[%s7009_s19 + $0xcfc] ss:$36 sps:$4 sm:$0xff]  }
 0x135   : > { %4246 = vmatprep.subr.bf16.mxu1 %v6134_v27  ;;  %v6218_v27 = vld [vmem:[%s7009_s19 + $0x117c] ss:$36 sps:$4 sm:$0xff]  }
 0x136   : > { %4156 = vmatmul.mubr.bf16.vlgmr.msra.gmra.mrb[8].mxu0 %v7100_v8 }
 0x137   : > { %4197 = vmatmul.mubr.bf16.vlgmr.msra.gmra.mrb[8].mxu1 %v7102_v9  ;;  %4206 = vmatpush1.bf16.msra.mxu0 %v6129_v28  ;;  %v6213_v28 = vld [vmem:[%s7009_s19 + $0xcf8] ss:$36 sps:$4 sm:$0xff]  }
 0x138   : > { %4247 = vmatpush1.bf16.msra.mxu1 %v6132_v29  ;;  %4207 = vmatprep.subr.bf16.mxu0 %v6137_v30  ;;  %v6216_v29 = vld [vmem:[%s7009_s19 + $0x1178] ss:$36 sps:$4 sm:$0xff]   ;;  %v6221_v30 = vld [vmem:[%s7009_s19 + $0xd44] ss:$36 sps:$4 sm:$0xff]  }
 0x139   : > { %4248 = vmatprep.subr.bf16.mxu1 %v6140_v31  ;;  %4237 = vmatprep.mubr.bf16.mxu0 %v7140_v38  ;;  %v6224_v31 = vld [vmem:[%s7009_s19 + $0x11c4] ss:$36 sps:$4 sm:$0xff]  }
 0x13a   : > { %4278 = vmatprep.mubr.bf16.mxu1 %v7144_v39 }
 0x13b   : > { %4208 = vmatpush1.bf16.msra.mxu0 %v6135_v32  ;;  %v6219_v32 = vld [vmem:[%s7009_s19 + $0xd40] ss:$36 sps:$4 sm:$0xff]  }
 0x13c   : > { %4249 = vmatpush1.bf16.msra.mxu1 %v6138_v33  ;;  %4209 = vmatprep.subr.bf16.mxu0 %v6143_v34  ;;  %v6222_v33 = vld [vmem:[%s7009_s19 + $0x11c0] ss:$36 sps:$4 sm:$0xff]   ;;  %v6227_v34 = vld [vmem:[%s7009_s19 + $0x14] ss:$36 sps:$4 sm:$0xff]  }
 0x13d   : > { %4250 = vmatprep.subr.bf16.mxu1 %v6146_v35  ;;  %v6230_v35 = vld [vmem:[%s7009_s19 + $0x494] ss:$36 sps:$4 sm:$0xff]  }
 0x13f   : > { %4210 = vmatpush1.bf16.msra.mxu0 %v6141_v36  ;;  %v6225_v36 = vld [vmem:[%s7009_s19 + $0x10] ss:$36 sps:$4 sm:$0xff]  }
 0x140   : > { %4251 = vmatpush1.bf16.msra.mxu1 %v6144_v37  ;;  %4211 = vmatprep.subr.bf16.mxu0 %v6149_v40  ;;  %v6228_v37 = vld [vmem:[%s7009_s19 + $0x490] ss:$36 sps:$4 sm:$0xff]   ;;  %v6233_v40 = vld [vmem:[%s7009_s19 + $0x5c] ss:$36 sps:$4 sm:$0xff]  }
 0x141   : > { %4252 = vmatprep.subr.bf16.mxu1 %v6152_v41  ;;  %v6236_v41 = vld [vmem:[%s7009_s19 + $0x4dc] ss:$36 sps:$4 sm:$0xff]  }
 0x143   : > { %4212 = vmatpush1.bf16.msra.mxu0 %v6147_v42  ;;  %v6231_v42 = vld [vmem:[%s7009_s19 + $0x58] ss:$36 sps:$4 sm:$0xff]  }
 0x144   : > { %4253 = vmatpush1.bf16.msra.mxu1 %v6150_v43  ;;  %4213 = vmatprep.subr.bf16.mxu0 %v6155_v44  ;;  %v6234_v43 = vld [vmem:[%s7009_s19 + $0x4d8] ss:$36 sps:$4 sm:$0xff]   ;;  %v6239_v44 = vld [vmem:[%s7009_s19 + $0xa4] ss:$36 sps:$4 sm:$0xff]  }
 0x145   : > { %4254 = vmatprep.subr.bf16.mxu1 %v6158_v45  ;;  %v6242_v45 = vld [vmem:[%s7009_s19 + $0x524] ss:$36 sps:$4 sm:$0xff]  }
 0x147   : > { %4214 = vmatpush1.bf16.msra.mxu0 %v6153_v46  ;;  %v6237_v46 = vld [vmem:[%s7009_s19 + $0xa0] ss:$36 sps:$4 sm:$0xff]  }
 0x148   : > { %4255 = vmatpush1.bf16.msra.mxu1 %v6156_v47  ;;  %4215 = vmatprep.subr.bf16.mxu0 %v6161_v48  ;;  %v6240_v47 = vld [vmem:[%s7009_s19 + $0x520] ss:$36 sps:$4 sm:$0xff]   ;;  %v6245_v48 = vld [vmem:[%s7009_s19 + $0xec] ss:$36 sps:$4 sm:$0xff]  }
 0x149   : > { %4256 = vmatprep.subr.bf16.mxu1 %v6164_v50  ;;  %v6248_v50 = vld [vmem:[%s7009_s19 + $0x56c] ss:$36 sps:$4 sm:$0xff]  }
 0x14b   : > { %4216 = vmatpush1.bf16.msra.mxu0 %v6159_v51  ;;  %v6243_v51 = vld [vmem:[%s7009_s19 + $0xe8] ss:$36 sps:$4 sm:$0xff]  }
 0x14c   : > { %4257 = vmatpush1.bf16.msra.mxu1 %v6162_v52  ;;  %4217 = vmatprep.subr.bf16.mxu0 %v6167_v54  ;;  %v6246_v52 = vld [vmem:[%s7009_s19 + $0x568] ss:$36 sps:$4 sm:$0xff]   ;;  %v6251_v54 = vld [vmem:[%s7009_s19 + $0x134] ss:$36 sps:$4 sm:$0xff]  }
 0x14d   : > { %4258 = vmatprep.subr.bf16.mxu1 %v6170_v55  ;;  %v6254_v55 = vld [vmem:[%s7009_s19 + $0x5b4] ss:$36 sps:$4 sm:$0xff]  }
 0x14f   : > { %4218 = vmatpush1.bf16.msra.mxu0 %v6165_v56  ;;  %v6249_v56 = vld [vmem:[%s7009_s19 + $0x130] ss:$36 sps:$4 sm:$0xff]  }
 0x150   : > { %4259 = vmatpush1.bf16.msra.mxu1 %v6168_v57  ;;  %4219 = vmatprep.subr.bf16.mxu0 %v6173_v58  ;;  %v6252_v57 = vld [vmem:[%s7009_s19 + $0x5b0] ss:$36 sps:$4 sm:$0xff]   ;;  %v6257_v58 = vld [vmem:[%s7009_s19 + $0x17c] ss:$36 sps:$4 sm:$0xff]  }
 0x151   : > { %4260 = vmatprep.subr.bf16.mxu1 %v6176_v59  ;;  %v6260_v59 = vld [vmem:[%s7009_s19 + $0x5fc] ss:$36 sps:$4 sm:$0xff]  }
 0x153   : > { %4220 = vmatpush1.bf16.msra.mxu0 %v6171_v60  ;;  %v6255_v60 = vld [vmem:[%s7009_s19 + $0x178] ss:$36 sps:$4 sm:$0xff]  }
 0x154   : > { %4261 = vmatpush1.bf16.msra.mxu1 %v6174_v61  ;;  %4221 = vmatprep.subr.bf16.mxu0 %v6179_v62  ;;  %v6258_v61 = vld [vmem:[%s7009_s19 + $0x5f8] ss:$36 sps:$4 sm:$0xff]   ;;  %v6263_v62 = vld [vmem:[%s7009_s19 + $0x1c4] ss:$36 sps:$4 sm:$0xff]  }
 0x155   : > { %4262 = vmatprep.subr.bf16.mxu1 %v6182_v63  ;;  %v6266_v63 = vld [vmem:[%s7009_s19 + $0x644] ss:$36 sps:$4 sm:$0xff]  }
 0x157   : > { %4222 = vmatpush1.bf16.msra.mxu0 %v6177_v0 }
 0x158   : > { %4263 = vmatpush1.bf16.msra.mxu1 %v6180_v1  ;;  %4223 = vmatprep.subr.bf16.mxu0 %v6185_v2  ;;  %v6261_v2 = vld [vmem:[%s7009_s19 + $0x1c0] ss:$36 sps:$4 sm:$0xff]  }
 0x159   : > { %4264 = vmatprep.subr.bf16.mxu1 %v6188_v3  ;;  %v6264_v3 = vld [vmem:[%s7009_s19 + $0x640] ss:$36 sps:$4 sm:$0xff]  }
 0x15b   : > { %4224 = vmatpush1.bf16.msra.mxu0 %v6183_v4 }
 0x15c   : > { %4265 = vmatpush1.bf16.msra.mxu1 %v6186_v5  ;;  %4225 = vmatprep.subr.bf16.mxu0 %v6191_v6 }
 0x15d   : > { %4266 = vmatprep.subr.bf16.mxu1 %v6194_v7 }
 0x15f   : > { %4226 = vmatpush1.bf16.msra.mxu0 %v6189_v10 }
 0x160   : > { %4267 = vmatpush1.bf16.msra.mxu1 %v6192_v11  ;;  %4227 = vmatprep.subr.bf16.mxu0 %v6197_v12 }
 0x161   : > { %4268 = vmatprep.subr.bf16.mxu1 %v6200_v13 }
 0x163   : > { %4228 = vmatpush1.bf16.msra.mxu0 %v6195_v14  ;;  %v6269_v14 = vld [vmem:[%s7009_s19 + $0x20c] ss:$36 sps:$4 sm:$0xff]  }
 0x164   : > { %4269 = vmatpush1.bf16.msra.mxu1 %v6198_v15  ;;  %4229 = vmatprep.subr.bf16.mxu0 %v6203_v16  ;;  %v6272_v15 = vld [vmem:[%s7009_s19 + $0x68c] ss:$36 sps:$4 sm:$0xff]  }
 0x165   : > { %4270 = vmatprep.subr.bf16.mxu1 %v6206_v17  ;;  %v6267_v16 = vld [vmem:[%s7009_s19 + $0x208] ss:$36 sps:$4 sm:$0xff]  }
 0x166   : > { %v6270_v17 = vld [vmem:[%s7009_s19 + $0x688] ss:$36 sps:$4 sm:$0xff]  }
 0x167   : > { %4230 = vmatpush1.bf16.msra.mxu0 %v6201_v20  ;;  %v6275_v20 = vld [vmem:[%s7009_s19 + $0x254] ss:$36 sps:$4 sm:$0xff]  }
 0x168   : > { %4271 = vmatpush1.bf16.msra.mxu1 %v6204_v21  ;;  %4231 = vmatprep.subr.bf16.mxu0 %v6209_v22  ;;  %v6278_v21 = vld [vmem:[%s7009_s19 + $0x6d4] ss:$36 sps:$4 sm:$0xff]  }
 0x169   : > { %4272 = vmatprep.subr.bf16.mxu1 %v6212_v23  ;;  %v6273_v22 = vld [vmem:[%s7009_s19 + $0x250] ss:$36 sps:$4 sm:$0xff]  }
 0x16a   : > { %v6276_v23 = vld [vmem:[%s7009_s19 + $0x6d0] ss:$36 sps:$4 sm:$0xff]  }
 0x16b   : > { %4232 = vmatpush1.bf16.msra.mxu0 %v6207_v24  ;;  %v6281_v24 = vld [vmem:[%s7009_s19 + $0x29c] ss:$36 sps:$4 sm:$0xff]  }
 0x16c   : > { %4273 = vmatpush1.bf16.msra.mxu1 %v6210_v25  ;;  %4233 = vmatprep.subr.bf16.mxu0 %v6215_v26  ;;  %v6284_v25 = vld [vmem:[%s7009_s19 + $0x71c] ss:$36 sps:$4 sm:$0xff]  }
 0x16d   : > { %4274 = vmatprep.subr.bf16.mxu1 %v6218_v27  ;;  %v6279_v26 = vld [vmem:[%s7009_s19 + $0x298] ss:$36 sps:$4 sm:$0xff]  }
 0x16e   : > { %v6282_v27 = vld [vmem:[%s7009_s19 + $0x718] ss:$36 sps:$4 sm:$0xff]  }
 0x16f   : > { %4234 = vmatpush1.bf16.msra.mxu0 %v6213_v28  ;;  %v6287_v28 = vld [vmem:[%s7009_s19 + $0x2e4] ss:$36 sps:$4 sm:$0xff]  }
 0x170   : > { %4275 = vmatpush1.bf16.msra.mxu1 %v6216_v29  ;;  %4235 = vmatprep.subr.bf16.mxu0 %v6221_v30  ;;  %v6290_v29 = vld [vmem:[%s7009_s19 + $0x764] ss:$36 sps:$4 sm:$0xff]  }
 0x171   : > { %4276 = vmatprep.subr.bf16.mxu1 %v6224_v31  ;;  %v6285_v30 = vld [vmem:[%s7009_s19 + $0x2e0] ss:$36 sps:$4 sm:$0xff]  }
 0x172   : > { %v6288_v31 = vld [vmem:[%s7009_s19 + $0x760] ss:$36 sps:$4 sm:$0xff]  }
 0x173   : > { %4236 = vmatpush1.bf16.msra.mxu0 %v6219_v32  ;;  %v6293_v32 = vld [vmem:[%s7009_s19 + $0x32c] ss:$36 sps:$4 sm:$0xff]  }
 0x174   : > { %4277 = vmatpush1.bf16.msra.mxu1 %v6222_v33  ;;  %4287 = vmatprep.subr.bf16.mxu0 %v6227_v34  ;;  %v6296_v33 = vld [vmem:[%s7009_s19 + $0x7ac] ss:$36 sps:$4 sm:$0xff]  }
 0x175   : > { %4328 = vmatprep.subr.bf16.mxu1 %v6230_v35  ;;  %v6291_v34 = vld [vmem:[%s7009_s19 + $0x328] ss:$36 sps:$4 sm:$0xff]  }
 0x176   : > { %4238 = vmatmul.mubr.bf16.vlgmr.msra.gmra.mrb[12].mxu0 %v7188_v18  ;;  %v6294_v35 = vld [vmem:[%s7009_s19 + $0x7a8] ss:$36 sps:$4 sm:$0xff]  }
 0x177   : > { %4279 = vmatmul.mubr.bf16.vlgmr.msra.gmra.mrb[12].mxu1 %v7192_v19  ;;  %4288 = vmatpush1.bf16.msra.mxu0 %v6225_v36  ;;  %v6299_v36 = vld [vmem:[%s7009_s19 + $0x374] ss:$36 sps:$4 sm:$0xff]  }
 0x178   : > { %4329 = vmatpush1.bf16.msra.mxu1 %v6228_v37  ;;  %4289 = vmatprep.subr.bf16.mxu0 %v6233_v40  ;;  %v6302_v37 = vld [vmem:[%s7009_s19 + $0x7f4] ss:$36 sps:$4 sm:$0xff]  }
 0x179   : > { %4330 = vmatprep.subr.bf16.mxu1 %v6236_v41  ;;  %4319 = vmatprep.mubr.bf16.mxu0 %v7073_v49  ;;  %v6297_v40 = vld [vmem:[%s7009_s19 + $0x370] ss:$36 sps:$4 sm:$0xff]  }
 0x17a   : > { %4360 = vmatprep.mubr.bf16.mxu1 %v7078_v53  ;;  %v6300_v41 = vld [vmem:[%s7009_s19 + $0x7f0] ss:$36 sps:$4 sm:$0xff]  }
 0x17b   : > { %4290 = vmatpush1.bf16.msra.mxu0 %v6231_v42  ;;  %v6305_v42 = vld [vmem:[%s7009_s19 + $0x3bc] ss:$36 sps:$4 sm:$0xff]  }
 0x17c   : > { %4331 = vmatpush1.bf16.msra.mxu1 %v6234_v43  ;;  %4291 = vmatprep.subr.bf16.mxu0 %v6239_v44  ;;  %v6308_v43 = vld [vmem:[%s7009_s19 + $0x83c] ss:$36 sps:$4 sm:$0xff]  }
 0x17d   : > { %4332 = vmatprep.subr.bf16.mxu1 %v6242_v45  ;;  %v6303_v44 = vld [vmem:[%s7009_s19 + $0x3b8] ss:$36 sps:$4 sm:$0xff]  }
 0x17e   : > { %v6306_v45 = vld [vmem:[%s7009_s19 + $0x838] ss:$36 sps:$4 sm:$0xff]  }
 0x17f   : > { %4292 = vmatpush1.bf16.msra.mxu0 %v6237_v46  ;;  %v6311_v46 = vld [vmem:[%s7009_s19 + $0x404] ss:$36 sps:$4 sm:$0xff]  }
 0x180   : > { %4333 = vmatpush1.bf16.msra.mxu1 %v6240_v47  ;;  %4293 = vmatprep.subr.bf16.mxu0 %v6245_v48  ;;  %v6314_v47 = vld [vmem:[%s7009_s19 + $0x884] ss:$36 sps:$4 sm:$0xff]  }
 0x181   : > { %4334 = vmatprep.subr.bf16.mxu1 %v6248_v50  ;;  %v6309_v48 = vld [vmem:[%s7009_s19 + $0x400] ss:$36 sps:$4 sm:$0xff]  }
 0x182   : > { %v6312_v50 = vld [vmem:[%s7009_s19 + $0x880] ss:$36 sps:$4 sm:$0xff]  }
 0x183   : > { %4294 = vmatpush1.bf16.msra.mxu0 %v6243_v51  ;;  %v6317_v51 = vld [vmem:[%s7009_s19 + $0x44c] ss:$36 sps:$4 sm:$0xff]  }
 0x184   : > { %4335 = vmatpush1.bf16.msra.mxu1 %v6246_v52  ;;  %4295 = vmatprep.subr.bf16.mxu0 %v6251_v54  ;;  %v6320_v52 = vld [vmem:[%s7009_s19 + $0x8cc] ss:$36 sps:$4 sm:$0xff]  }
 0x185   : > { %4336 = vmatprep.subr.bf16.mxu1 %v6254_v55  ;;  %v6315_v54 = vld [vmem:[%s7009_s19 + $0x448] ss:$36 sps:$4 sm:$0xff]  }
 0x186   : > { %v6318_v55 = vld [vmem:[%s7009_s19 + $0x8c8] ss:$36 sps:$4 sm:$0xff]  }
 0x187   : > { %4296 = vmatpush1.bf16.msra.mxu0 %v6249_v56  ;;  %v6323_v56 = vld [vmem:[%s7009_s19 + $0x914] ss:$36 sps:$4 sm:$0xff]  }
 0x188   : > { %4337 = vmatpush1.bf16.msra.mxu1 %v6252_v57  ;;  %4297 = vmatprep.subr.bf16.mxu0 %v6257_v58  ;;  %v6326_v57 = vld [vmem:[%s7009_s19 + $0xd94] ss:$36 sps:$4 sm:$0xff]  }
 0x189   : > { %4338 = vmatprep.subr.bf16.mxu1 %v6260_v59  ;;  %v3993_v0 = vpop.f32.mrb[0].mxu0  ;;  %v6321_v58 = vld [vmem:[%s7009_s19 + $0x910] ss:$36 sps:$4 sm:$0xff]  }
 0x18a   : > { %v4034_v1 = vpop.f32.mrb[0].mxu1  ;;  %v3995_v5 = vpop.f32.mrb[1].mxu0  ;;  %v6324_v59 = vld [vmem:[%s7009_s19 + $0xd90] ss:$36 sps:$4 sm:$0xff]  }
 0x18b   : > { %v7360_v4 = vadd.f32 %v4034_v1, %v3993_v0  ;;  %v4036_v6 = vpop.f32.mrb[1].mxu1  ;;  %v3997_v10 = vpop.f32.mrb[2].mxu0  ;;  %4298 = vmatpush1.bf16.msra.mxu0 %v6255_v60  ;;  %v6329_v60 = vld [vmem:[%s7009_s19 + $0x95c] ss:$36 sps:$4 sm:$0xff]   ;;  %v6335_v0 = vld [vmem:[%s7009_s19 + $0x9a4] ss:$36 sps:$4 sm:$0xff]  }
 0x18c   : > { %v7362_v7 = vadd.f32 %v4036_v6, %v3995_v5  ;;  %v4038_v11 = vpop.f32.mrb[2].mxu1  ;;  %4339 = vmatpush1.bf16.msra.mxu1 %v6258_v61  ;;  %v3998_v12 = vpop.f32.mrb[3].mxu0  ;;  %4299 = vmatprep.subr.bf16.mxu0 %v6263_v62  ;;  %v6332_v61 = vld [vmem:[%s7009_s19 + $0xddc] ss:$36 sps:$4 sm:$0xff]   ;;  %v6338_v1 = vld [vmem:[%s7009_s19 + $0xe24] ss:$36 sps:$4 sm:$0xff]  }
 0x18d   : > { %v4039_v13 = vpop.f32.mrb[3].mxu1  ;;  %4340 = vmatprep.subr.bf16.mxu1 %v6266_v63  ;;  %v6327_v62 = vld [vmem:[%s7009_s19 + $0x958] ss:$36 sps:$4 sm:$0xff]   ;;  %v6341_v5 = vld [vmem:[%s7009_s19 + $0x9ec] ss:$36 sps:$4 sm:$0xff]  }
 0x18e   : > { %v6330_v63 = vld [vmem:[%s7009_s19 + $0xdd8] ss:$36 sps:$4 sm:$0xff]   ;;  %v6344_v6 = vld [vmem:[%s7009_s19 + $0xe6c] ss:$36 sps:$4 sm:$0xff]  }
 0x18f   : > { %4300 = vmatpush1.bf16.msra.mxu0 %v6261_v2  ;;  %v6333_v2 = vld [vmem:[%s7009_s19 + $0x9a0] ss:$36 sps:$4 sm:$0xff]   ;;  %v6339_v10 = vld [vmem:[%s7009_s19 + $0x9e8] ss:$36 sps:$4 sm:$0xff]   ;;  %v6347_v12 = vld [vmem:[%s7009_s19 + $0xa34] ss:$36 sps:$4 sm:$0xff]  }
 0x190   : > { %4341 = vmatpush1.bf16.msra.mxu1 %v6264_v3  ;;  %4301 = vmatprep.subr.bf16.mxu0 %v6269_v14  ;;  %v6336_v3 = vld [vmem:[%s7009_s19 + $0xe20] ss:$36 sps:$4 sm:$0xff]   ;;  %v6342_v11 = vld [vmem:[%s7009_s19 + $0xe68] ss:$36 sps:$4 sm:$0xff]   ;;  %v6350_v13 = vld [vmem:[%s7009_s19 + $0xeb4] ss:$36 sps:$4 sm:$0xff]  }
 0x191   : > { %4342 = vmatprep.subr.bf16.mxu1 %v6272_v15  ;;  %v6345_v14 = vld [vmem:[%s7009_s19 + $0xa30] ss:$36 sps:$4 sm:$0xff]  }
 0x192   : > { %v6348_v15 = vld [vmem:[%s7009_s19 + $0xeb0] ss:$36 sps:$4 sm:$0xff]  }
 0x193   : > { %4302 = vmatpush1.bf16.msra.mxu0 %v6267_v16  ;;  %v6353_v16 = vld [vmem:[%s7009_s19 + $0xa7c] ss:$36 sps:$4 sm:$0xff]  }
 0x194   : > { %4343 = vmatpush1.bf16.msra.mxu1 %v6270_v17  ;;  %4303 = vmatprep.subr.bf16.mxu0 %v6275_v20  ;;  %v6356_v17 = vld [vmem:[%s7009_s19 + $0xefc] ss:$36 sps:$4 sm:$0xff]  }
 0x195   : > { %4344 = vmatprep.subr.bf16.mxu1 %v6278_v21  ;;  %v6351_v20 = vld [vmem:[%s7009_s19 + $0xa78] ss:$36 sps:$4 sm:$0xff]  }
 0x196   : > { %v6354_v21 = vld [vmem:[%s7009_s19 + $0xef8] ss:$36 sps:$4 sm:$0xff]  }
 0x197   : > { %4304 = vmatpush1.bf16.msra.mxu0 %v6273_v22  ;;  %v6359_v22 = vld [vmem:[%s7009_s19 + $0xac4] ss:$36 sps:$4 sm:$0xff]  }
 0x198   : > { %4345 = vmatpush1.bf16.msra.mxu1 %v6276_v23  ;;  %4305 = vmatprep.subr.bf16.mxu0 %v6281_v24  ;;  %v6362_v23 = vld [vmem:[%s7009_s19 + $0xf44] ss:$36 sps:$4 sm:$0xff]  }
 0x199   : > { %4346 = vmatprep.subr.bf16.mxu1 %v6284_v25  ;;  %v334_v25 = vld [vmem:[#allocation2] sm:$0xff] }
 0x19b   : > { %4306 = vmatpush1.bf16.msra.mxu0 %v6279_v26 }
 0x19c   : > { %4347 = vmatpush1.bf16.msra.mxu1 %v6282_v27  ;;  %4307 = vmatprep.subr.bf16.mxu0 %v6287_v28  ;;  %v6357_v27 = vld [vmem:[%s7009_s19 + $0xac0] ss:$36 sps:$4 sm:$0xff]  }
 0x19d   : > { %4348 = vmatprep.subr.bf16.mxu1 %v6290_v29 }
 0x19f   : > { %4308 = vmatpush1.bf16.msra.mxu0 %v6285_v30  ;;  %v335_v30 = vld [vmem:[#allocation2 + $0x8] sm:$0xff] }
 0x1a0   : > { %4349 = vmatpush1.bf16.msra.mxu1 %v6288_v31  ;;  %4309 = vmatprep.subr.bf16.mxu0 %v6293_v32  ;;  %v6360_v32 = vld [vmem:[%s7009_s19 + $0xf40] ss:$36 sps:$4 sm:$0xff]  }
 0x1a1   : > { %4350 = vmatprep.subr.bf16.mxu1 %v6296_v33 }
 0x1a3   : > { %4310 = vmatpush1.bf16.msra.mxu0 %v6291_v34 }
 0x1a4   : > { %4351 = vmatpush1.bf16.msra.mxu1 %v6294_v35  ;;  %4311 = vmatprep.subr.bf16.mxu0 %v6299_v36 }
 0x1a5   : > { %4352 = vmatprep.subr.bf16.mxu1 %v6302_v37 }
 0x1a7   : > { %4312 = vmatpush1.bf16.msra.mxu0 %v6297_v40 }
 0x1a8   : > { %4353 = vmatpush1.bf16.msra.mxu1 %v6300_v41  ;;  %4313 = vmatprep.subr.bf16.mxu0 %v6305_v42  ;;  %v6368_v41 = vld [vmem:[%s7009_s19 + $0xf8c] ss:$36 sps:$4 sm:$0xff]  }
 0x1a9   : > { %4354 = vmatprep.subr.bf16.mxu1 %v6308_v43  ;;  %v6363_v43 = vld [vmem:[%s7009_s19 + $0xb08] ss:$36 sps:$4 sm:$0xff]  }
 0x1ab   : > { %4314 = vmatpush1.bf16.msra.mxu0 %v6303_v44 }
 0x1ac   : > { %4355 = vmatpush1.bf16.msra.mxu1 %v6306_v45  ;;  %4315 = vmatprep.subr.bf16.mxu0 %v6311_v46  ;;  %v6366_v45 = vld [vmem:[%s7009_s19 + $0xf88] ss:$36 sps:$4 sm:$0xff]   ;;  %v6371_v46 = vld [vmem:[%s7009_s19 + $0xb54] ss:$36 sps:$4 sm:$0xff]  }
 0x1ad   : > { %4356 = vmatprep.subr.bf16.mxu1 %v6314_v47  ;;  %v6374_v47 = vld [vmem:[%s7009_s19 + $0xfd4] ss:$36 sps:$4 sm:$0xff]  }
 0x1af   : > { %4316 = vmatpush1.bf16.msra.mxu0 %v6309_v48  ;;  %v6369_v48 = vld [vmem:[%s7009_s19 + $0xb50] ss:$36 sps:$4 sm:$0xff]  }
 0x1b0   : > { %4357 = vmatpush1.bf16.msra.mxu1 %v6312_v50  ;;  %4317 = vmatprep.subr.bf16.mxu0 %v6317_v51  ;;  %v6372_v50 = vld [vmem:[%s7009_s19 + $0xfd0] ss:$36 sps:$4 sm:$0xff]   ;;  %v6377_v51 = vld [vmem:[%s7009_s19 + $0xb9c] ss:$36 sps:$4 sm:$0xff]  }
 0x1b1   : > { %4358 = vmatprep.subr.bf16.mxu1 %v6320_v52  ;;  %v6380_v52 = vld [vmem:[%s7009_s19 + $0x101c] ss:$36 sps:$4 sm:$0xff]  }
 0x1b3   : > { %4318 = vmatpush1.bf16.msra.mxu0 %v6315_v54  ;;  %v6375_v54 = vld [vmem:[%s7009_s19 + $0xb98] ss:$36 sps:$4 sm:$0xff]  }
 0x1b4   : > { %4359 = vmatpush1.bf16.msra.mxu1 %v6318_v55  ;;  %4369 = vmatprep.subr.bf16.mxu0 %v6323_v56  ;;  %v6378_v55 = vld [vmem:[%s7009_s19 + $0x1018] ss:$36 sps:$4 sm:$0xff]   ;;  %v6383_v56 = vld [vmem:[%s7009_s19 + $0xbe4] ss:$36 sps:$4 sm:$0xff]  }
 0x1b5   : > { %4410 = vmatprep.subr.bf16.mxu1 %v6326_v57  ;;  %v6386_v57 = vld [vmem:[%s7009_s19 + $0x1064] ss:$36 sps:$4 sm:$0xff]  }
 0x1b6   : > { %4320 = vmatmul.mubr.bf16.vlgmr.msra.gmra.mrb[16].mxu0 %v7100_v8 }
 0x1b7   : > { %4361 = vmatmul.mubr.bf16.vlgmr.msra.gmra.mrb[16].mxu1 %v7102_v9  ;;  %4370 = vmatpush1.bf16.msra.mxu0 %v6321_v58  ;;  %v6381_v58 = vld [vmem:[%s7009_s19 + $0xbe0] ss:$36 sps:$4 sm:$0xff]  }
 0x1b8   : > { %4411 = vmatpush1.bf16.msra.mxu1 %v6324_v59  ;;  %4371 = vmatprep.subr.bf16.mxu0 %v6329_v60  ;;  %v6384_v59 = vld [vmem:[%s7009_s19 + $0x1060] ss:$36 sps:$4 sm:$0xff]   ;;  %v6389_v60 = vld [vmem:[%s7009_s19 + $0xc2c] ss:$36 sps:$4 sm:$0xff]  }
 0x1b9   : > { %4412 = vmatprep.subr.bf16.mxu1 %v6332_v61  ;;  %4401 = vmatprep.mubr.bf16.mxu0 %v7140_v38  ;;  %v6392_v61 = vld [vmem:[%s7009_s19 + $0x10ac] ss:$36 sps:$4 sm:$0xff]  }
 0x1ba   : > { %4442 = vmatprep.mubr.bf16.mxu1 %v7144_v39 }
 0x1bb   : > { %4372 = vmatpush1.bf16.msra.mxu0 %v6327_v62  ;;  %v6387_v62 = vld [vmem:[%s7009_s19 + $0xc28] ss:$36 sps:$4 sm:$0xff]  }
 0x1bc   : > { %4413 = vmatpush1.bf16.msra.mxu1 %v6330_v63  ;;  %4373 = vmatprep.subr.bf16.mxu0 %v6335_v0  ;;  %v6390_v63 = vld [vmem:[%s7009_s19 + $0x10a8] ss:$36 sps:$4 sm:$0xff]   ;;  %v6395_v0 = vld [vmem:[%s7009_s19 + $0xc74] ss:$36 sps:$4 sm:$0xff]  }
 0x1bd   : > { %4414 = vmatprep.subr.bf16.mxu1 %v6338_v1  ;;  %v6398_v1 = vld [vmem:[%s7009_s19 + $0x10f4] ss:$36 sps:$4 sm:$0xff]  }
 0x1bf   : > { %4374 = vmatpush1.bf16.msra.mxu0 %v6333_v2  ;;  %v6393_v2 = vld [vmem:[%s7009_s19 + $0xc70] ss:$36 sps:$4 sm:$0xff]  }
 0x1c0   : > { %4415 = vmatpush1.bf16.msra.mxu1 %v6336_v3  ;;  %4375 = vmatprep.subr.bf16.mxu0 %v6341_v5  ;;  %v6396_v3 = vld [vmem:[%s7009_s19 + $0x10f0] ss:$36 sps:$4 sm:$0xff]   ;;  %v6401_v5 = vld [vmem:[%s7009_s19 + $0xcbc] ss:$36 sps:$4 sm:$0xff]  }
 0x1c1   : > { %4416 = vmatprep.subr.bf16.mxu1 %v6344_v6  ;;  %v6404_v6 = vld [vmem:[%s7009_s19 + $0x113c] ss:$36 sps:$4 sm:$0xff]  }
 0x1c3   : > { %4376 = vmatpush1.bf16.msra.mxu0 %v6339_v10  ;;  %v6399_v10 = vld [vmem:[%s7009_s19 + $0xcb8] ss:$36 sps:$4 sm:$0xff]  }
 0x1c4   : > { %4417 = vmatpush1.bf16.msra.mxu1 %v6342_v11  ;;  %4377 = vmatprep.subr.bf16.mxu0 %v6347_v12  ;;  %v6402_v11 = vld [vmem:[%s7009_s19 + $0x1138] ss:$36 sps:$4 sm:$0xff]   ;;  %v6407_v12 = vld [vmem:[%s7009_s19 + $0xd04] ss:$36 sps:$4 sm:$0xff]  }
 0x1c5   : > { %4418 = vmatprep.subr.bf16.mxu1 %v6350_v13  ;;  %v6410_v13 = vld [vmem:[%s7009_s19 + $0x1184] ss:$36 sps:$4 sm:$0xff]  }
 0x1c7   : > { %4378 = vmatpush1.bf16.msra.mxu0 %v6345_v14  ;;  %v6405_v14 = vld [vmem:[%s7009_s19 + $0xd00] ss:$36 sps:$4 sm:$0xff]  }
 0x1c8   : > { %4419 = vmatpush1.bf16.msra.mxu1 %v6348_v15  ;;  %4379 = vmatprep.subr.bf16.mxu0 %v6353_v16  ;;  %v6408_v15 = vld [vmem:[%s7009_s19 + $0x1180] ss:$36 sps:$4 sm:$0xff]   ;;  %v6413_v16 = vld [vmem:[%s7009_s19 + $0xd4c] ss:$36 sps:$4 sm:$0xff]  }
 0x1c9   : > { %4420 = vmatprep.subr.bf16.mxu1 %v6356_v17  ;;  %v4075_v24 = vpop.f32.mrb[4].mxu0  ;;  %v6416_v17 = vld [vmem:[%s7009_s19 + $0x11cc] ss:$36 sps:$4 sm:$0xff]  }
 0x1ca   : > { %v4116_v26 = vpop.f32.mrb[4].mxu1  ;;  %v4076_v28 = vadd.f32 %v4075_v24, %v7360_v4  ;;  %v4077_v29 = vpop.f32.mrb[5].mxu0  ;;  %v6365_v4 = vld [vmem:[%s7009_s19 + $0xb0c] ss:$36 sps:$4 sm:$0xff]   ;;  %v6417_v24 = vld [vmem:[%s7009_s19 + $0x18] ss:$36 sps:$4 sm:$0xff]  }
 0x1cb   : > { %v4118_v31 = vpop.f32.mrb[5].mxu1  ;;  %v4078_v33 = vadd.f32 %v4077_v29, %v7362_v7  ;;  %v4079_v34 = vpop.f32.mrb[6].mxu0  ;;  %4380 = vmatpush1.bf16.msra.mxu0 %v6351_v20  ;;  %v6411_v20 = vld [vmem:[%s7009_s19 + $0xd48] ss:$36 sps:$4 sm:$0xff]   ;;  %v6426_v29 = vld [vmem:[%s7009_s19 + $0x4e0] ss:$36 sps:$4 sm:$0xff]  }
 0x1cc   : > { %v4120_v35 = vpop.f32.mrb[6].mxu1  ;;  %4421 = vmatpush1.bf16.msra.mxu1 %v6354_v21  ;;  %v4117_v36 = vadd.f32 %v4116_v26, %v4076_v28  ;;  %v4080_v37 = vpop.f32.mrb[7].mxu0  ;;  %4381 = vmatprep.subr.bf16.mxu0 %v6359_v22  ;;  %v6414_v21 = vld [vmem:[%s7009_s19 + $0x11c8] ss:$36 sps:$4 sm:$0xff]   ;;  %v6419_v22 = vld [vmem:[%s7009_s19 + $0x1c] ss:$36 sps:$4 sm:$0xff]  }
 0x1cd   : > { %v4121_v40 = vpop.f32.mrb[7].mxu1  ;;  %4422 = vmatprep.subr.bf16.mxu1 %v6362_v23  ;;  %v4119_v42 = vadd.f32 %v4118_v31, %v4078_v33  ;;  %v6422_v23 = vld [vmem:[%s7009_s19 + $0x49c] ss:$36 sps:$4 sm:$0xff]   ;;  %v6425_v26 = vld [vmem:[%s7009_s19 + $0x64] ss:$36 sps:$4 sm:$0xff]  }
 0x1ce   : > { %v4775_v44 = vadd.f32 %v4117_v36, %v334_v25  ;;  %v6420_v25 = vld [vmem:[%s7009_s19 + $0x498] ss:$36 sps:$4 sm:$0xff]   ;;  %v6423_v28 = vld [vmem:[%s7009_s19 + $0x60] ss:$36 sps:$4 sm:$0xff]   ;;  %v6434_v31 = vld [vmem:[%s7009_s19 + $0x52c] ss:$36 sps:$4 sm:$0xff]  }
 0x1cf   : > { %v4776_v7 = vadd.f32 %v4119_v42, %v335_v30  ;;  %4382 = vmatpush1.bf16.msra.mxu0 %v6357_v27  ;;  %v6428_v27 = vld [vmem:[%s7009_s19 + $0x4e4] ss:$36 sps:$4 sm:$0xff]   ;;  %v6431_v30 = vld [vmem:[%s7009_s19 + $0xac] ss:$36 sps:$4 sm:$0xff]   ;;  %v6437_v34 = vld [vmem:[%s7009_s19 + $0xf4] ss:$36 sps:$4 sm:$0xff]  }
 0x1d0   : > { %4423 = vmatpush1.bf16.msra.mxu1 %v6360_v32  ;;  %4784 = vst [vmem:[#allocation2] sm:$0xff] %v4775_v44  ;;  %4383 = vmatprep.subr.bf16.mxu0 %v6365_v4  ;;  %v6429_v32 = vld [vmem:[%s7009_s19 + $0xa8] ss:$36 sps:$4 sm:$0xff]   ;;  %v6440_v35 = vld [vmem:[%s7009_s19 + $0x574] ss:$36 sps:$4 sm:$0xff]  }
 0x1d1   : > { %4424 = vmatprep.subr.bf16.mxu1 %v6368_v41  ;;  %4785 = vst [vmem:[#allocation2 + $0x8] sm:$0xff] %v4776_v7  ;;  %v6432_v33 = vld [vmem:[%s7009_s19 + $0x528] ss:$36 sps:$4 sm:$0xff]   ;;  %v6435_v36 = vld [vmem:[%s7009_s19 + $0xf0] ss:$36 sps:$4 sm:$0xff]  }
 0x1d2   : > { %v6438_v37 = vld [vmem:[%s7009_s19 + $0x570] ss:$36 sps:$4 sm:$0xff]   ;;  %v6443_v40 = vld [vmem:[%s7009_s19 + $0x13c] ss:$36 sps:$4 sm:$0xff]   ;;  %v6452_v44 = vld [vmem:[%s7009_s19 + $0x604] ss:$36 sps:$4 sm:$0xff]  }
 0x1d3   : > { %4384 = vmatpush1.bf16.msra.mxu0 %v6363_v43  ;;  %v6446_v4 = vld [vmem:[%s7009_s19 + $0x5bc] ss:$36 sps:$4 sm:$0xff]   ;;  %v6449_v43 = vld [vmem:[%s7009_s19 + $0x184] ss:$36 sps:$4 sm:$0xff]  }
 0x1d4   : > { %4425 = vmatpush1.bf16.msra.mxu1 %v6366_v45  ;;  %4385 = vmatprep.subr.bf16.mxu0 %v6371_v46  ;;  %v6441_v41 = vld [vmem:[%s7009_s19 + $0x138] ss:$36 sps:$4 sm:$0xff]   ;;  %v6447_v45 = vld [vmem:[%s7009_s19 + $0x180] ss:$36 sps:$4 sm:$0xff]   ;;  %v6455_v46 = vld [vmem:[%s7009_s19 + $0x1cc] ss:$36 sps:$4 sm:$0xff]  }
 0x1d5   : > { %4426 = vmatprep.subr.bf16.mxu1 %v6374_v47  ;;  %v6444_v42 = vld [vmem:[%s7009_s19 + $0x5b8] ss:$36 sps:$4 sm:$0xff]   ;;  %v6450_v7 = vld [vmem:[%s7009_s19 + $0x600] ss:$36 sps:$4 sm:$0xff]   ;;  %v6458_v47 = vld [vmem:[%s7009_s19 + $0x64c] ss:$36 sps:$4 sm:$0xff]  }
 0x1d7   : > { %4386 = vmatpush1.bf16.msra.mxu0 %v6369_v48 }
 0x1d8   : > { %4427 = vmatpush1.bf16.msra.mxu1 %v6372_v50  ;;  %4387 = vmatprep.subr.bf16.mxu0 %v6377_v51 }
 0x1d9   : > { %4428 = vmatprep.subr.bf16.mxu1 %v6380_v52 }
 0x1db   : > { %4388 = vmatpush1.bf16.msra.mxu0 %v6375_v54 }
 0x1dc   : > { %4429 = vmatpush1.bf16.msra.mxu1 %v6378_v55  ;;  %4389 = vmatprep.subr.bf16.mxu0 %v6383_v56 }
 0x1dd   : > { %4430 = vmatprep.subr.bf16.mxu1 %v6386_v57 }
 0x1df   : > { %4390 = vmatpush1.bf16.msra.mxu0 %v6381_v58  ;;  %v6453_v58 = vld [vmem:[%s7009_s19 + $0x1c8] ss:$36 sps:$4 sm:$0xff]  }
 0x1e0   : > { %4431 = vmatpush1.bf16.msra.mxu1 %v6384_v59  ;;  %4391 = vmatprep.subr.bf16.mxu0 %v6389_v60  ;;  %v6456_v59 = vld [vmem:[%s7009_s19 + $0x648] ss:$36 sps:$4 sm:$0xff]  }
 0x1e1   : > { %4432 = vmatprep.subr.bf16.mxu1 %v6392_v61 }
 0x1e3   : > { %4392 = vmatpush1.bf16.msra.mxu0 %v6387_v62  ;;  %v6461_v62 = vld [vmem:[%s7009_s19 + $0x214] ss:$36 sps:$4 sm:$0xff]  }
 0x1e4   : > { %4433 = vmatpush1.bf16.msra.mxu1 %v6390_v63  ;;  %4393 = vmatprep.subr.bf16.mxu0 %v6395_v0  ;;  %v6464_v63 = vld [vmem:[%s7009_s19 + $0x694] ss:$36 sps:$4 sm:$0xff]  }
 0x1e5   : > { %4434 = vmatprep.subr.bf16.mxu1 %v6398_v1  ;;  %v6459_v0 = vld [vmem:[%s7009_s19 + $0x210] ss:$36 sps:$4 sm:$0xff]  }
 0x1e6   : > { %v6462_v1 = vld [vmem:[%s7009_s19 + $0x690] ss:$36 sps:$4 sm:$0xff]  }
 0x1e7   : > { %4394 = vmatpush1.bf16.msra.mxu0 %v6393_v2  ;;  %v6467_v2 = vld [vmem:[%s7009_s19 + $0x25c] ss:$36 sps:$4 sm:$0xff]  }
 0x1e8   : > { %4435 = vmatpush1.bf16.msra.mxu1 %v6396_v3  ;;  %4395 = vmatprep.subr.bf16.mxu0 %v6401_v5  ;;  %v6470_v3 = vld [vmem:[%s7009_s19 + $0x6dc] ss:$36 sps:$4 sm:$0xff]  }
 0x1e9   : > { %4436 = vmatprep.subr.bf16.mxu1 %v6404_v6  ;;  %v6465_v5 = vld [vmem:[%s7009_s19 + $0x258] ss:$36 sps:$4 sm:$0xff]  }
 0x1ea   : > { %v6468_v6 = vld [vmem:[%s7009_s19 + $0x6d8] ss:$36 sps:$4 sm:$0xff]  }
 0x1eb   : > { %4396 = vmatpush1.bf16.msra.mxu0 %v6399_v10  ;;  %v6473_v10 = vld [vmem:[%s7009_s19 + $0x2a4] ss:$36 sps:$4 sm:$0xff]  }
 0x1ec   : > { %4437 = vmatpush1.bf16.msra.mxu1 %v6402_v11  ;;  %4397 = vmatprep.subr.bf16.mxu0 %v6407_v12  ;;  %v6476_v11 = vld [vmem:[%s7009_s19 + $0x724] ss:$36 sps:$4 sm:$0xff]  }
 0x1ed   : > { %4438 = vmatprep.subr.bf16.mxu1 %v6410_v13  ;;  %v6471_v12 = vld [vmem:[%s7009_s19 + $0x2a0] ss:$36 sps:$4 sm:$0xff]  }
 0x1ee   : > { %v6474_v13 = vld [vmem:[%s7009_s19 + $0x720] ss:$36 sps:$4 sm:$0xff]  }
 0x1ef   : > { %4398 = vmatpush1.bf16.msra.mxu0 %v6405_v14  ;;  %v6479_v14 = vld [vmem:[%s7009_s19 + $0x2ec] ss:$36 sps:$4 sm:$0xff]  }
 0x1f0   : > { %4439 = vmatpush1.bf16.msra.mxu1 %v6408_v15  ;;  %4399 = vmatprep.subr.bf16.mxu0 %v6413_v16  ;;  %v6482_v15 = vld [vmem:[%s7009_s19 + $0x76c] ss:$36 sps:$4 sm:$0xff]  }
 0x1f1   : > { %4440 = vmatprep.subr.bf16.mxu1 %v6416_v17  ;;  %v6477_v16 = vld [vmem:[%s7009_s19 + $0x2e8] ss:$36 sps:$4 sm:$0xff]  }
 0x1f2   : > { %v6480_v17 = vld [vmem:[%s7009_s19 + $0x768] ss:$36 sps:$4 sm:$0xff]  }
 0x1f3   : > { %4400 = vmatpush1.bf16.msra.mxu0 %v6411_v20  ;;  %v6485_v20 = vld [vmem:[%s7009_s19 + $0x334] ss:$36 sps:$4 sm:$0xff]  }
 0x1f4   : > { %4441 = vmatpush1.bf16.msra.mxu1 %v6414_v21  ;;  %4451 = vmatprep.subr.bf16.mxu0 %v6419_v22  ;;  %v6488_v21 = vld [vmem:[%s7009_s19 + $0x7b4] ss:$36 sps:$4 sm:$0xff]  }
 0x1f5   : > { %4492 = vmatprep.subr.bf16.mxu1 %v6422_v23  ;;  %v6483_v22 = vld [vmem:[%s7009_s19 + $0x330] ss:$36 sps:$4 sm:$0xff]  }
 0x1f6   : > { %4402 = vmatmul.mubr.bf16.vlgmr.msra.gmra.mrb[20].mxu0 %v7188_v18  ;;  %v6486_v23 = vld [vmem:[%s7009_s19 + $0x7b0] ss:$36 sps:$4 sm:$0xff]  }
 0x1f7   : > { %4443 = vmatmul.mubr.bf16.vlgmr.msra.gmra.mrb[20].mxu1 %v7192_v19  ;;  %4452 = vmatpush1.bf16.msra.mxu0 %v6417_v24  ;;  %v6491_v24 = vld [vmem:[%s7009_s19 + $0x37c] ss:$36 sps:$4 sm:$0xff]  }
 0x1f8   : > { %4493 = vmatpush1.bf16.msra.mxu1 %v6420_v25  ;;  %4453 = vmatprep.subr.bf16.mxu0 %v6425_v26  ;;  %v6494_v25 = vld [vmem:[%s7009_s19 + $0x7fc] ss:$36 sps:$4 sm:$0xff]  }
 0x1f9   : > { %4494 = vmatprep.subr.bf16.mxu1 %v6428_v27  ;;  %4483 = vmatprep.mubr.bf16.mxu0 %v7073_v49  ;;  %v6489_v26 = vld [vmem:[%s7009_s19 + $0x378] ss:$36 sps:$4 sm:$0xff]  }
 0x1fa   : > { %4524 = vmatprep.mubr.bf16.mxu1 %v7078_v53  ;;  %v6492_v27 = vld [vmem:[%s7009_s19 + $0x7f8] ss:$36 sps:$4 sm:$0xff]  }
 0x1fb   : > { %4454 = vmatpush1.bf16.msra.mxu0 %v6423_v28  ;;  %v6497_v28 = vld [vmem:[%s7009_s19 + $0x3c4] ss:$36 sps:$4 sm:$0xff]  }
 0x1fc   : > { %4495 = vmatpush1.bf16.msra.mxu1 %v6426_v29  ;;  %4455 = vmatprep.subr.bf16.mxu0 %v6431_v30  ;;  %v6500_v29 = vld [vmem:[%s7009_s19 + $0x844] ss:$36 sps:$4 sm:$0xff]  }
 0x1fd   : > { %4496 = vmatprep.subr.bf16.mxu1 %v6434_v31  ;;  %v6495_v30 = vld [vmem:[%s7009_s19 + $0x3c0] ss:$36 sps:$4 sm:$0xff]  }
 0x1fe   : > { %v6498_v31 = vld [vmem:[%s7009_s19 + $0x840] ss:$36 sps:$4 sm:$0xff]  }
 0x1ff   : > { %4456 = vmatpush1.bf16.msra.mxu0 %v6429_v32  ;;  %v6503_v32 = vld [vmem:[%s7009_s19 + $0x40c] ss:$36 sps:$4 sm:$0xff]  }
 0x200   : > { %4497 = vmatpush1.bf16.msra.mxu1 %v6432_v33  ;;  %4457 = vmatprep.subr.bf16.mxu0 %v6437_v34  ;;  %v6506_v33 = vld [vmem:[%s7009_s19 + $0x88c] ss:$36 sps:$4 sm:$0xff]  }
 0x201   : > { %4498 = vmatprep.subr.bf16.mxu1 %v6440_v35  ;;  %v6501_v34 = vld [vmem:[%s7009_s19 + $0x408] ss:$36 sps:$4 sm:$0xff]  }
 0x202   : > { %v6504_v35 = vld [vmem:[%s7009_s19 + $0x888] ss:$36 sps:$4 sm:$0xff]  }
 0x203   : > { %4458 = vmatpush1.bf16.msra.mxu0 %v6435_v36  ;;  %v6509_v36 = vld [vmem:[%s7009_s19 + $0x454] ss:$36 sps:$4 sm:$0xff]  }
 0x204   : > { %4499 = vmatpush1.bf16.msra.mxu1 %v6438_v37  ;;  %4459 = vmatprep.subr.bf16.mxu0 %v6443_v40  ;;  %v6512_v37 = vld [vmem:[%s7009_s19 + $0x8d4] ss:$36 sps:$4 sm:$0xff]  }
 0x205   : > { %4500 = vmatprep.subr.bf16.mxu1 %v6446_v4  ;;  %v6507_v40 = vld [vmem:[%s7009_s19 + $0x450] ss:$36 sps:$4 sm:$0xff]  }
 0x206   : > { %v6510_v4 = vld [vmem:[%s7009_s19 + $0x8d0] ss:$36 sps:$4 sm:$0xff]  }
 0x207   : > { %4460 = vmatpush1.bf16.msra.mxu0 %v6441_v41  ;;  %v6515_v41 = vld [vmem:[%s7009_s19 + $0x91c] ss:$36 sps:$4 sm:$0xff]  }
 0x208   : > { %4501 = vmatpush1.bf16.msra.mxu1 %v6444_v42  ;;  %4461 = vmatprep.subr.bf16.mxu0 %v6449_v43  ;;  %v6518_v42 = vld [vmem:[%s7009_s19 + $0xd9c] ss:$36 sps:$4 sm:$0xff]  }
 0x209   : > { %4502 = vmatprep.subr.bf16.mxu1 %v6452_v44  ;;  %v4157_v48 = vpop.f32.mrb[8].mxu0  ;;  %v6513_v43 = vld [vmem:[%s7009_s19 + $0x918] ss:$36 sps:$4 sm:$0xff]  }
 0x20a   : > { %v4198_v50 = vpop.f32.mrb[8].mxu1  ;;  %v4159_v52 = vpop.f32.mrb[9].mxu0  ;;  %v6516_v44 = vld [vmem:[%s7009_s19 + $0xd98] ss:$36 sps:$4 sm:$0xff]  }
 0x20b   : > { %v7500_v51 = vadd.f32 %v4198_v50, %v4157_v48  ;;  %v4200_v54 = vpop.f32.mrb[9].mxu1  ;;  %v4161_v56 = vpop.f32.mrb[10].mxu0  ;;  %4462 = vmatpush1.bf16.msra.mxu0 %v6447_v45  ;;  %v6521_v45 = vld [vmem:[%s7009_s19 + $0x964] ss:$36 sps:$4 sm:$0xff]   ;;  %v6527_v48 = vld [vmem:[%s7009_s19 + $0x9ac] ss:$36 sps:$4 sm:$0xff]  }
 0x20c   : > { %v7502_v55 = vadd.f32 %v4200_v54, %v4159_v52  ;;  %v4202_v57 = vpop.f32.mrb[10].mxu1  ;;  %4503 = vmatpush1.bf16.msra.mxu1 %v6450_v7  ;;  %v4162_v60 = vpop.f32.mrb[11].mxu0  ;;  %4463 = vmatprep.subr.bf16.mxu0 %v6455_v46  ;;  %v6524_v7 = vld [vmem:[%s7009_s19 + $0xde4] ss:$36 sps:$4 sm:$0xff]   ;;  %v6530_v50 = vld [vmem:[%s7009_s19 + $0xe2c] ss:$36 sps:$4 sm:$0xff]  }
 0x20d   : > { %v4203_v61 = vpop.f32.mrb[11].mxu1  ;;  %4504 = vmatprep.subr.bf16.mxu1 %v6458_v47  ;;  %v6519_v46 = vld [vmem:[%s7009_s19 + $0x960] ss:$36 sps:$4 sm:$0xff]   ;;  %v6525_v52 = vld [vmem:[%s7009_s19 + $0x9a8] ss:$36 sps:$4 sm:$0xff]  }
 0x20e   : > { %v6522_v47 = vld [vmem:[%s7009_s19 + $0xde0] ss:$36 sps:$4 sm:$0xff]   ;;  %v6528_v54 = vld [vmem:[%s7009_s19 + $0xe28] ss:$36 sps:$4 sm:$0xff]   ;;  %v6533_v56 = vld [vmem:[%s7009_s19 + $0x9f4] ss:$36 sps:$4 sm:$0xff]  }
 0x20f   : > { %4464 = vmatpush1.bf16.msra.mxu0 %v6453_v58  ;;  %v6536_v57 = vld [vmem:[%s7009_s19 + $0xe74] ss:$36 sps:$4 sm:$0xff]   ;;  %v6539_v60 = vld [vmem:[%s7009_s19 + $0xa3c] ss:$36 sps:$4 sm:$0xff]  }
 0x210   : > { %4505 = vmatpush1.bf16.msra.mxu1 %v6456_v59  ;;  %4465 = vmatprep.subr.bf16.mxu0 %v6461_v62  ;;  %v6531_v58 = vld [vmem:[%s7009_s19 + $0x9f0] ss:$36 sps:$4 sm:$0xff]   ;;  %v6542_v61 = vld [vmem:[%s7009_s19 + $0xebc] ss:$36 sps:$4 sm:$0xff]  }
 0x211   : > { %4506 = vmatprep.subr.bf16.mxu1 %v6464_v63  ;;  %v6534_v59 = vld [vmem:[%s7009_s19 + $0xe70] ss:$36 sps:$4 sm:$0xff]   ;;  %v6537_v62 = vld [vmem:[%s7009_s19 + $0xa38] ss:$36 sps:$4 sm:$0xff]  }
 0x212   : > { %v6540_v63 = vld [vmem:[%s7009_s19 + $0xeb8] ss:$36 sps:$4 sm:$0xff]  }
 0x213   : > { %4466 = vmatpush1.bf16.msra.mxu0 %v6459_v0  ;;  %v6545_v0 = vld [vmem:[%s7009_s19 + $0xa84] ss:$36 sps:$4 sm:$0xff]  }
 0x214   : > { %4507 = vmatpush1.bf16.msra.mxu1 %v6462_v1  ;;  %4467 = vmatprep.subr.bf16.mxu0 %v6467_v2  ;;  %v6548_v1 = vld [vmem:[%s7009_s19 + $0xf04] ss:$36 sps:$4 sm:$0xff]  }
 0x215   : > { %4508 = vmatprep.subr.bf16.mxu1 %v6470_v3  ;;  %v6543_v2 = vld [vmem:[%s7009_s19 + $0xa80] ss:$36 sps:$4 sm:$0xff]  }
 0x216   : > { %v6546_v3 = vld [vmem:[%s7009_s19 + $0xf00] ss:$36 sps:$4 sm:$0xff]  }
 0x217   : > { %4468 = vmatpush1.bf16.msra.mxu0 %v6465_v5  ;;  %v6551_v5 = vld [vmem:[%s7009_s19 + $0xacc] ss:$36 sps:$4 sm:$0xff]  }
 0x218   : > { %4509 = vmatpush1.bf16.msra.mxu1 %v6468_v6  ;;  %4469 = vmatprep.subr.bf16.mxu0 %v6473_v10  ;;  %v6554_v6 = vld [vmem:[%s7009_s19 + $0xf4c] ss:$36 sps:$4 sm:$0xff]  }
 0x219   : > { %4510 = vmatprep.subr.bf16.mxu1 %v6476_v11 }
 0x21b   : > { %4470 = vmatpush1.bf16.msra.mxu0 %v6471_v12 }
 0x21c   : > { %4511 = vmatpush1.bf16.msra.mxu1 %v6474_v13  ;;  %4471 = vmatprep.subr.bf16.mxu0 %v6479_v14 }
 0x21d   : > { %4512 = vmatprep.subr.bf16.mxu1 %v6482_v15  ;;  %v6549_v15 = vld [vmem:[%s7009_s19 + $0xac8] ss:$36 sps:$4 sm:$0xff]  }
 0x21f   : > { %4472 = vmatpush1.bf16.msra.mxu0 %v6477_v16  ;;  %v336_v16 = vld [vmem:[#allocation2 + $0x10] sm:$0xff] }
 0x220   : > { %4513 = vmatpush1.bf16.msra.mxu1 %v6480_v17  ;;  %4473 = vmatprep.subr.bf16.mxu0 %v6485_v20  ;;  %v337_v20 = vld [vmem:[#allocation2 + $0x18] sm:$0xff] }
 0x221   : > { %4514 = vmatprep.subr.bf16.mxu1 %v6488_v21 }
 0x223   : > { %4474 = vmatpush1.bf16.msra.mxu0 %v6483_v22 }
 0x224   : > { %4515 = vmatpush1.bf16.msra.mxu1 %v6486_v23  ;;  %4475 = vmatprep.subr.bf16.mxu0 %v6491_v24  ;;  %v6552_v23 = vld [vmem:[%s7009_s19 + $0xf48] ss:$36 sps:$4 sm:$0xff]  }
 0x225   : > { %4516 = vmatprep.subr.bf16.mxu1 %v6494_v25 }
 0x227   : > { %4476 = vmatpush1.bf16.msra.mxu0 %v6489_v26  ;;  %v6557_v26 = vld [vmem:[%s7009_s19 + $0xb14] ss:$36 sps:$4 sm:$0xff]  }
 0x228   : > { %4517 = vmatpush1.bf16.msra.mxu1 %v6492_v27  ;;  %4477 = vmatprep.subr.bf16.mxu0 %v6497_v28  ;;  %v6560_v27 = vld [vmem:[%s7009_s19 + $0xf94] ss:$36 sps:$4 sm:$0xff]  }
 0x229   : > { %4518 = vmatprep.subr.bf16.mxu1 %v6500_v29 }
 0x22b   : > { %4478 = vmatpush1.bf16.msra.mxu0 %v6495_v30  ;;  %v6555_v30 = vld [vmem:[%s7009_s19 + $0xb10] ss:$36 sps:$4 sm:$0xff]  }
 0x22c   : > { %4519 = vmatpush1.bf16.msra.mxu1 %v6498_v31  ;;  %4479 = vmatprep.subr.bf16.mxu0 %v6503_v32  ;;  %v6558_v31 = vld [vmem:[%s7009_s19 + $0xf90] ss:$36 sps:$4 sm:$0xff]   ;;  %v6563_v32 = vld [vmem:[%s7009_s19 + $0xb5c] ss:$36 sps:$4 sm:$0xff]  }
 0x22d   : > { %4520 = vmatprep.subr.bf16.mxu1 %v6506_v33  ;;  %v6566_v33 = vld [vmem:[%s7009_s19 + $0xfdc] ss:$36 sps:$4 sm:$0xff]  }
 0x22f   : > { %4480 = vmatpush1.bf16.msra.mxu0 %v6501_v34  ;;  %v6561_v34 = vld [vmem:[%s7009_s19 + $0xb58] ss:$36 sps:$4 sm:$0xff]  }
 0x230   : > { %4521 = vmatpush1.bf16.msra.mxu1 %v6504_v35  ;;  %4481 = vmatprep.subr.bf16.mxu0 %v6509_v36  ;;  %v6564_v35 = vld [vmem:[%s7009_s19 + $0xfd8] ss:$36 sps:$4 sm:$0xff]   ;;  %v6569_v36 = vld [vmem:[%s7009_s19 + $0xba4] ss:$36 sps:$4 sm:$0xff]  }
 0x231   : > { %4522 = vmatprep.subr.bf16.mxu1 %v6512_v37  ;;  %v6572_v37 = vld [vmem:[%s7009_s19 + $0x1024] ss:$36 sps:$4 sm:$0xff]  }
 0x233   : > { %4482 = vmatpush1.bf16.msra.mxu0 %v6507_v40  ;;  %v6567_v40 = vld [vmem:[%s7009_s19 + $0xba0] ss:$36 sps:$4 sm:$0xff]  }
 0x234   : > { %4523 = vmatpush1.bf16.msra.mxu1 %v6510_v4  ;;  %4533 = vmatprep.subr.bf16.mxu0 %v6515_v41  ;;  %v6570_v4 = vld [vmem:[%s7009_s19 + $0x1020] ss:$36 sps:$4 sm:$0xff]   ;;  %v6575_v41 = vld [vmem:[%s7009_s19 + $0xbec] ss:$36 sps:$4 sm:$0xff]  }
 0x235   : > { %4574 = vmatprep.subr.bf16.mxu1 %v6518_v42  ;;  %v6578_v42 = vld [vmem:[%s7009_s19 + $0x106c] ss:$36 sps:$4 sm:$0xff]  }
 0x236   : > { %4484 = vmatmul.mubr.bf16.vlgmr.msra.gmra.mrb[24].mxu0 %v7100_v8 }
 0x237   : > { %4525 = vmatmul.mubr.bf16.vlgmr.msra.gmra.mrb[24].mxu1 %v7102_v9  ;;  %4534 = vmatpush1.bf16.msra.mxu0 %v6513_v43  ;;  %v6573_v43 = vld [vmem:[%s7009_s19 + $0xbe8] ss:$36 sps:$4 sm:$0xff]  }
 0x238   : > { %4575 = vmatpush1.bf16.msra.mxu1 %v6516_v44  ;;  %4535 = vmatprep.subr.bf16.mxu0 %v6521_v45  ;;  %v6576_v44 = vld [vmem:[%s7009_s19 + $0x1068] ss:$36 sps:$4 sm:$0xff]   ;;  %v6581_v45 = vld [vmem:[%s7009_s19 + $0xc34] ss:$36 sps:$4 sm:$0xff]  }
 0x239   : > { %4576 = vmatprep.subr.bf16.mxu1 %v6524_v7  ;;  %4565 = vmatprep.mubr.bf16.mxu0 %v7140_v38  ;;  %v6584_v7 = vld [vmem:[%s7009_s19 + $0x10b4] ss:$36 sps:$4 sm:$0xff]  }
 0x23a   : > { %4606 = vmatprep.mubr.bf16.mxu1 %v7144_v39 }
 0x23b   : > { %4536 = vmatpush1.bf16.msra.mxu0 %v6519_v46  ;;  %v6579_v46 = vld [vmem:[%s7009_s19 + $0xc30] ss:$36 sps:$4 sm:$0xff]  }
 0x23c   : > { %4577 = vmatpush1.bf16.msra.mxu1 %v6522_v47  ;;  %4537 = vmatprep.subr.bf16.mxu0 %v6527_v48  ;;  %v6582_v47 = vld [vmem:[%s7009_s19 + $0x10b0] ss:$36 sps:$4 sm:$0xff]   ;;  %v6587_v48 = vld [vmem:[%s7009_s19 + $0xc7c] ss:$36 sps:$4 sm:$0xff]  }
 0x23d   : > { %4578 = vmatprep.subr.bf16.mxu1 %v6530_v50  ;;  %v6590_v50 = vld [vmem:[%s7009_s19 + $0x10fc] ss:$36 sps:$4 sm:$0xff]  }
 0x23f   : > { %4538 = vmatpush1.bf16.msra.mxu0 %v6525_v52  ;;  %v6585_v52 = vld [vmem:[%s7009_s19 + $0xc78] ss:$36 sps:$4 sm:$0xff]  }
 0x240   : > { %4579 = vmatpush1.bf16.msra.mxu1 %v6528_v54  ;;  %4539 = vmatprep.subr.bf16.mxu0 %v6533_v56  ;;  %v6588_v54 = vld [vmem:[%s7009_s19 + $0x10f8] ss:$36 sps:$4 sm:$0xff]   ;;  %v6593_v56 = vld [vmem:[%s7009_s19 + $0xcc4] ss:$36 sps:$4 sm:$0xff]  }
 0x241   : > { %4580 = vmatprep.subr.bf16.mxu1 %v6536_v57  ;;  %v6596_v57 = vld [vmem:[%s7009_s19 + $0x1144] ss:$36 sps:$4 sm:$0xff]  }
 0x243   : > { %4540 = vmatpush1.bf16.msra.mxu0 %v6531_v58  ;;  %v6591_v58 = vld [vmem:[%s7009_s19 + $0xcc0] ss:$36 sps:$4 sm:$0xff]  }
 0x244   : > { %4581 = vmatpush1.bf16.msra.mxu1 %v6534_v59  ;;  %4541 = vmatprep.subr.bf16.mxu0 %v6539_v60  ;;  %v6594_v59 = vld [vmem:[%s7009_s19 + $0x1140] ss:$36 sps:$4 sm:$0xff]   ;;  %v6599_v60 = vld [vmem:[%s7009_s19 + $0xd0c] ss:$36 sps:$4 sm:$0xff]  }
 0x245   : > { %4582 = vmatprep.subr.bf16.mxu1 %v6542_v61  ;;  %v6602_v61 = vld [vmem:[%s7009_s19 + $0x118c] ss:$36 sps:$4 sm:$0xff]  }
 0x247   : > { %4542 = vmatpush1.bf16.msra.mxu0 %v6537_v62  ;;  %v6597_v62 = vld [vmem:[%s7009_s19 + $0xd08] ss:$36 sps:$4 sm:$0xff]  }
 0x248   : > { %4583 = vmatpush1.bf16.msra.mxu1 %v6540_v63  ;;  %4543 = vmatprep.subr.bf16.mxu0 %v6545_v0  ;;  %v6600_v63 = vld [vmem:[%s7009_s19 + $0x1188] ss:$36 sps:$4 sm:$0xff]   ;;  %v6605_v0 = vld [vmem:[%s7009_s19 + $0xd54] ss:$36 sps:$4 sm:$0xff]  }
 0x249   : > { %4584 = vmatprep.subr.bf16.mxu1 %v6548_v1  ;;  %v4239_v10 = vpop.f32.mrb[12].mxu0  ;;  %v6608_v1 = vld [vmem:[%s7009_s19 + $0x11d4] ss:$36 sps:$4 sm:$0xff]  }
 0x24a   : > { %v4280_v11 = vpop.f32.mrb[12].mxu1  ;;  %v4240_v12 = vadd.f32 %v4239_v10, %v7500_v51  ;;  %v4241_v13 = vpop.f32.mrb[13].mxu0  ;;  %v6611_v10 = vld [vmem:[%s7009_s19 + $0x20] ss:$36 sps:$4 sm:$0xff]  }
 0x24b   : > { %v4282_v14 = vpop.f32.mrb[13].mxu1  ;;  %v4242_v17 = vadd.f32 %v4241_v13, %v7502_v55  ;;  %v4243_v21 = vpop.f32.mrb[14].mxu0  ;;  %4544 = vmatpush1.bf16.msra.mxu0 %v6543_v2  ;;  %v6603_v2 = vld [vmem:[%s7009_s19 + $0xd50] ss:$36 sps:$4 sm:$0xff]   ;;  %v6614_v13 = vld [vmem:[%s7009_s19 + $0x728] ss:$36 sps:$4 sm:$0xff]  }
 0x24c   : > { %v4284_v22 = vpop.f32.mrb[14].mxu1  ;;  %4585 = vmatpush1.bf16.msra.mxu1 %v6546_v3  ;;  %v4281_v24 = vadd.f32 %v4280_v11, %v4240_v12  ;;  %v4244_v25 = vpop.f32.mrb[15].mxu0  ;;  %4545 = vmatprep.subr.bf16.mxu0 %v6551_v5  ;;  %v6606_v3 = vld [vmem:[%s7009_s19 + $0x11d0] ss:$36 sps:$4 sm:$0xff]   ;;  %v6609_v5 = vld [vmem:[%s7009_s19 + $0x260] ss:$36 sps:$4 sm:$0xff]  }
 0x24d   : > { %v4285_v51 = vpop.f32.mrb[15].mxu1  ;;  %4586 = vmatprep.subr.bf16.mxu1 %v6554_v6  ;;  %v4283_v28 = vadd.f32 %v4282_v14, %v4242_v17  ;;  %v6610_v6 = vld [vmem:[%s7009_s19 + $0x6e0] ss:$36 sps:$4 sm:$0xff]   ;;  %v6613_v12 = vld [vmem:[%s7009_s19 + $0x2a8] ss:$36 sps:$4 sm:$0xff]  }
 0x24e   : > { %v4777_v55 = vadd.f32 %v4281_v24, %v336_v16  ;;  %v6612_v11 = vld [vmem:[%s7009_s19 + $0x4a0] ss:$36 sps:$4 sm:$0xff]   ;;  %v6615_v14 = vld [vmem:[%s7009_s19 + $0x68] ss:$36 sps:$4 sm:$0xff]   ;;  %v6617_v16 = vld [vmem:[%s7009_s19 + $0x2f0] ss:$36 sps:$4 sm:$0xff]  }
 0x24f   : > { %v4778_v29 = vadd.f32 %v4283_v28, %v337_v20  ;;  %4546 = vmatpush1.bf16.msra.mxu0 %v6549_v15  ;;  %v6616_v15 = vld [vmem:[%s7009_s19 + $0x4e8] ss:$36 sps:$4 sm:$0xff]   ;;  %v6618_v17 = vld [vmem:[%s7009_s19 + $0x770] ss:$36 sps:$4 sm:$0xff]   ;;  %v6621_v22 = vld [vmem:[%s7009_s19 + $0x338] ss:$36 sps:$4 sm:$0xff]  }
 0x250   : > { %4587 = vmatpush1.bf16.msra.mxu1 %v6552_v23  ;;  %4786 = vst [vmem:[#allocation2 + $0x10] sm:$0xff] %v4777_v55  ;;  %4547 = vmatprep.subr.bf16.mxu0 %v6557_v26  ;;  %v6619_v20 = vld [vmem:[%s7009_s19 + $0xb0] ss:$36 sps:$4 sm:$0xff]   ;;  %v6622_v23 = vld [vmem:[%s7009_s19 + $0x7b8] ss:$36 sps:$4 sm:$0xff]  }
 0x251   : > { %4588 = vmatprep.subr.bf16.mxu1 %v6560_v27  ;;  %4787 = vst [vmem:[#allocation2 + $0x18] sm:$0xff] %v4778_v29  ;;  %v6620_v21 = vld [vmem:[%s7009_s19 + $0x530] ss:$36 sps:$4 sm:$0xff]   ;;  %v6623_v24 = vld [vmem:[%s7009_s19 + $0xf8] ss:$36 sps:$4 sm:$0xff]  }
 0x252   : > { %v6626_v25 = vld [vmem:[%s7009_s19 + $0x800] ss:$36 sps:$4 sm:$0xff]   ;;  %v6629_v27 = vld [vmem:[%s7009_s19 + $0x3c8] ss:$36 sps:$4 sm:$0xff]  }
 0x253   : > { %4548 = vmatpush1.bf16.msra.mxu0 %v6555_v30  ;;  %v6627_v51 = vld [vmem:[%s7009_s19 + $0x140] ss:$36 sps:$4 sm:$0xff]   ;;  %v6630_v28 = vld [vmem:[%s7009_s19 + $0x848] ss:$36 sps:$4 sm:$0xff]   ;;  %v6633_v30 = vld [vmem:[%s7009_s19 + $0x410] ss:$36 sps:$4 sm:$0xff]  }
 0x254   : > { %4589 = vmatpush1.bf16.msra.mxu1 %v6558_v31  ;;  %4549 = vmatprep.subr.bf16.mxu0 %v6563_v32  ;;  %v6628_v26 = vld [vmem:[%s7009_s19 + $0x5c0] ss:$36 sps:$4 sm:$0xff]   ;;  %v6631_v55 = vld [vmem:[%s7009_s19 + $0x188] ss:$36 sps:$4 sm:$0xff]   ;;  %v6634_v31 = vld [vmem:[%s7009_s19 + $0x890] ss:$36 sps:$4 sm:$0xff]  }
 0x255   : > { %4590 = vmatprep.subr.bf16.mxu1 %v6566_v33  ;;  %v6632_v29 = vld [vmem:[%s7009_s19 + $0x608] ss:$36 sps:$4 sm:$0xff]  }
 0x257   : > { %4550 = vmatpush1.bf16.msra.mxu0 %v6561_v34 }
 0x258   : > { %4591 = vmatpush1.bf16.msra.mxu1 %v6564_v35  ;;  %4551 = vmatprep.subr.bf16.mxu0 %v6569_v36 }
 0x259   : > { %4592 = vmatprep.subr.bf16.mxu1 %v6572_v37 }
 0x25b   : > { %4552 = vmatpush1.bf16.msra.mxu0 %v6567_v40 }
 0x25c   : > { %4593 = vmatpush1.bf16.msra.mxu1 %v6570_v4  ;;  %4553 = vmatprep.subr.bf16.mxu0 %v6575_v41  ;;  %v6635_v41 = vld [vmem:[%s7009_s19 + $0x1d0] ss:$36 sps:$4 sm:$0xff]  }
 0x25d   : > { %4594 = vmatprep.subr.bf16.mxu1 %v6578_v42  ;;  %v6636_v42 = vld [vmem:[%s7009_s19 + $0x650] ss:$36 sps:$4 sm:$0xff]  }
 0x25f   : > { %4554 = vmatpush1.bf16.msra.mxu0 %v6573_v43 }
 0x260   : > { %4595 = vmatpush1.bf16.msra.mxu1 %v6576_v44  ;;  %4555 = vmatprep.subr.bf16.mxu0 %v6581_v45  ;;  %v6637_v45 = vld [vmem:[%s7009_s19 + $0x458] ss:$36 sps:$4 sm:$0xff]  }
 0x261   : > { %4596 = vmatprep.subr.bf16.mxu1 %v6584_v7  ;;  %v6638_v7 = vld [vmem:[%s7009_s19 + $0x8d8] ss:$36 sps:$4 sm:$0xff]  }
 0x263   : > { %4556 = vmatpush1.bf16.msra.mxu0 %v6579_v46  ;;  %v6639_v46 = vld [vmem:[%s7009_s19 + $0x218] ss:$36 sps:$4 sm:$0xff]  }
 0x264   : > { %4597 = vmatpush1.bf16.msra.mxu1 %v6582_v47  ;;  %4557 = vmatprep.subr.bf16.mxu0 %v6587_v48  ;;  %v6640_v47 = vld [vmem:[%s7009_s19 + $0x698] ss:$36 sps:$4 sm:$0xff]   ;;  %v6641_v48 = vld [vmem:[%s7009_s19 + $0xb60] ss:$36 sps:$4 sm:$0xff]  }
 0x265   : > { %4598 = vmatprep.subr.bf16.mxu1 %v6590_v50  ;;  %v6642_v50 = vld [vmem:[%s7009_s19 + $0xfe0] ss:$36 sps:$4 sm:$0xff]  }
 0x267   : > { %4558 = vmatpush1.bf16.msra.mxu0 %v6585_v52  ;;  %v6643_v52 = vld [vmem:[%s7009_s19 + $0x920] ss:$36 sps:$4 sm:$0xff]  }
 0x268   : > { %4599 = vmatpush1.bf16.msra.mxu1 %v6588_v54  ;;  %4559 = vmatprep.subr.bf16.mxu0 %v6593_v56  ;;  %v6644_v54 = vld [vmem:[%s7009_s19 + $0xda0] ss:$36 sps:$4 sm:$0xff]   ;;  %v6645_v56 = vld [vmem:[%s7009_s19 + $0xba8] ss:$36 sps:$4 sm:$0xff]  }
 0x269   : > { %4600 = vmatprep.subr.bf16.mxu1 %v6596_v57  ;;  %v6646_v57 = vld [vmem:[%s7009_s19 + $0x1028] ss:$36 sps:$4 sm:$0xff]  }
 0x26b   : > { %4560 = vmatpush1.bf16.msra.mxu0 %v6591_v58  ;;  %v6647_v58 = vld [vmem:[%s7009_s19 + $0x968] ss:$36 sps:$4 sm:$0xff]  }
 0x26c   : > { %4601 = vmatpush1.bf16.msra.mxu1 %v6594_v59  ;;  %4561 = vmatprep.subr.bf16.mxu0 %v6599_v60  ;;  %v6648_v59 = vld [vmem:[%s7009_s19 + $0xde8] ss:$36 sps:$4 sm:$0xff]   ;;  %v6649_v60 = vld [vmem:[%s7009_s19 + $0xbf0] ss:$36 sps:$4 sm:$0xff]  }
 0x26d   : > { %4602 = vmatprep.subr.bf16.mxu1 %v6602_v61  ;;  %v6650_v61 = vld [vmem:[%s7009_s19 + $0x1070] ss:$36 sps:$4 sm:$0xff]  }
 0x26f   : > { %4562 = vmatpush1.bf16.msra.mxu0 %v6597_v62  ;;  %v6653_v62 = vld [vmem:[%s7009_s19 + $0xc38] ss:$36 sps:$4 sm:$0xff]  }
 0x270   : > { %4603 = vmatpush1.bf16.msra.mxu1 %v6600_v63  ;;  %4563 = vmatprep.subr.bf16.mxu0 %v6605_v0  ;;  %v6654_v63 = vld [vmem:[%s7009_s19 + $0x10b8] ss:$36 sps:$4 sm:$0xff]  }
 0x271   : > { %4604 = vmatprep.subr.bf16.mxu1 %v6608_v1  ;;  %v6655_v0 = vld [vmem:[%s7009_s19 + $0x9f8] ss:$36 sps:$4 sm:$0xff]   ;;  %v6658_v1 = vld [vmem:[%s7009_s19 + $0x1100] ss:$36 sps:$4 sm:$0xff]  }
 0x273   : > { %4564 = vmatpush1.bf16.msra.mxu0 %v6603_v2  ;;  %v6659_v2 = vld [vmem:[%s7009_s19 + $0xa40] ss:$36 sps:$4 sm:$0xff]  }
 0x274   : > { %4605 = vmatpush1.bf16.msra.mxu1 %v6606_v3  ;;  %5663 = vmatprep.subr.bf16.mxu0 %v6609_v5  ;;  %v6660_v3 = vld [vmem:[%s7009_s19 + $0xec0] ss:$36 sps:$4 sm:$0xff]   ;;  %v6661_v5 = vld [vmem:[%s7009_s19 + $0xcc8] ss:$36 sps:$4 sm:$0xff]  }
 0x275   : > { %5685 = vmatprep.subr.bf16.mxu1 %v6610_v6  ;;  %v6662_v6 = vld [vmem:[%s7009_s19 + $0x1148] ss:$36 sps:$4 sm:$0xff]  }
 0x276   : > { %4566 = vmatmul.mubr.bf16.vlgmr.msra.gmra.mrb[28].mxu0 %v7188_v18 }
 0x277   : > { %4607 = vmatmul.mubr.bf16.vlgmr.msra.gmra.mrb[28].mxu1 %v7192_v19  ;;  %5664 = vmatpush3.bf16.msra.mxu0 %v6611_v10  ;;  %v6663_v10 = vld [vmem:[%s7009_s19 + $0xa88] ss:$36 sps:$4 sm:$0xff]  }
 0x278   : > { %5686 = vmatpush3.bf16.msra.mxu1 %v6612_v11  ;;  %5665 = vmatprep.subr.bf16.mxu0 %v6613_v12  ;;  %v6664_v11 = vld [vmem:[%s7009_s19 + $0xf08] ss:$36 sps:$4 sm:$0xff]   ;;  %v6665_v12 = vld [vmem:[%s7009_s19 + $0xd10] ss:$36 sps:$4 sm:$0xff]  }
 0x279   : > { %5687 = vmatprep.subr.bf16.mxu1 %v6614_v13  ;;  %4647 = vmatprep.mubr.bf16.mxu0 %v7073_v49  ;;  %v6624_v49 = vld [vmem:[%s7009_s19 + $0x578] ss:$36 sps:$4 sm:$0xff]   ;;  %v6666_v13 = vld [vmem:[%s7009_s19 + $0x1190] ss:$36 sps:$4 sm:$0xff]  }
 0x27a   : > { %4687 = vmatprep.mubr.bf16.mxu1 %v7078_v53  ;;  %v6625_v53 = vld [vmem:[%s7009_s19 + $0x380] ss:$36 sps:$4 sm:$0xff]  }
 0x27b   : > { %5666 = vmatpush3.bf16.msra.mxu0 %v6615_v14  ;;  %v6667_v14 = vld [vmem:[%s7009_s19 + $0xad0] ss:$36 sps:$4 sm:$0xff]  }
 0x27c   : > { %5688 = vmatpush3.bf16.msra.mxu1 %v6616_v15  ;;  %5667 = vmatprep.subr.bf16.mxu0 %v6617_v16  ;;  %v6668_v15 = vld [vmem:[%s7009_s19 + $0xf50] ss:$36 sps:$4 sm:$0xff]   ;;  %v6669_v16 = vld [vmem:[%s7009_s19 + $0xd58] ss:$36 sps:$4 sm:$0xff]  }
 0x27d   : > { %5689 = vmatprep.subr.bf16.mxu1 %v6618_v17  ;;  %v6670_v17 = vld [vmem:[%s7009_s19 + $0x11d8] ss:$36 sps:$4 sm:$0xff]  }
 0x27f   : > { %5668 = vmatpush3.bf16.msra.mxu0 %v6619_v20  ;;  %v6671_v20 = vld [vmem:[%s7009_s19 + $0xb18] ss:$36 sps:$4 sm:$0xff]  }
 0x280   : > { %5690 = vmatpush3.bf16.msra.mxu1 %v6620_v21  ;;  %5669 = vmatprep.subr.bf16.mxu0 %v6621_v22  ;;  %v6672_v21 = vld [vmem:[%s7009_s19 + $0xf98] ss:$36 sps:$4 sm:$0xff]  }
 0x281   : > { %5691 = vmatprep.subr.bf16.mxu1 %v6622_v23 }
 0x283   : > { %5670 = vmatpush3.bf16.msra.mxu0 %v6623_v24 }
 0x284   : > { %5692 = vmatpush3.bf16.msra.mxu1 %v6624_v49  ;;  %5671 = vmatprep.subr.bf16.mxu0 %v6625_v53 }
 0x285   : > { %5693 = vmatprep.subr.bf16.mxu1 %v6626_v25  ;;  %v338_v25 = vld [vmem:[#allocation2 + $0x20] sm:$0xff] }
 0x287   : > { %5672 = vmatpush3.bf16.msra.mxu0 %v6627_v51 }
 0x288   : > { %5694 = vmatpush3.bf16.msra.mxu1 %v6628_v26  ;;  %5673 = vmatprep.subr.bf16.mxu0 %v6629_v27 }
 0x289   : > { %5695 = vmatprep.subr.bf16.mxu1 %v6630_v28  ;;  %v4321_v32 = vpop.f32.mrb[16].mxu0 }
 0x28a   : > { %v4362_v33 = vpop.f32.mrb[16].mxu1  ;;  %v4323_v35 = vpop.f32.mrb[17].mxu0 }
 0x28b   : > { %v7642_v34 = vadd.f32 %v4362_v33, %v4321_v32  ;;  %v4364_v36 = vpop.f32.mrb[17].mxu1  ;;  %v4325_v40 = vpop.f32.mrb[18].mxu0  ;;  %5674 = vmatpush3.bf16.msra.mxu0 %v6631_v55  ;;  %v339_v55 = vld [vmem:[#allocation2 + $0x28] sm:$0xff] }
 0x28c   : > { %v7644_v37 = vadd.f32 %v4364_v36, %v4323_v35  ;;  %v4366_v4 = vpop.f32.mrb[18].mxu1  ;;  %5696 = vmatpush3.bf16.msra.mxu1 %v6632_v29  ;;  %v4326_v43 = vpop.f32.mrb[19].mxu0  ;;  %5675 = vmatprep.subr.bf16.mxu0 %v6633_v30 }
 0x28d   : > { %v4367_v44 = vpop.f32.mrb[19].mxu1  ;;  %5697 = vmatprep.subr.bf16.mxu1 %v6634_v31 }
 0x28f   : > { %5676 = vmatpush3.bf16.msra.mxu0 %v6635_v41 }
 0x290   : > { %5698 = vmatpush3.bf16.msra.mxu1 %v6636_v42  ;;  %5677 = vmatprep.subr.bf16.mxu0 %v6637_v45 }
 0x291   : > { %5699 = vmatprep.subr.bf16.mxu1 %v6638_v7 }
 0x293   : > { %5678 = vmatpush3.bf16.msra.mxu0 %v6639_v46 }
 0x294   : > { %5700 = vmatpush3.bf16.msra.mxu1 %v6640_v47  ;;  %5707 = vmatprep.subr.bf16.mxu0 %v6641_v48  ;;  %v340_v47 = vld [vmem:[#allocation2 + $0x30] sm:$0xff] }
 0x295   : > { %5729 = vmatprep.subr.bf16.mxu1 %v6642_v50 }
 0x296   : > { %4648 = vmatmul.mubr.bf16.vlgmr.msra.gmra.mrb[32].mxu0 %v7100_v8  ;;  %v6651_v8 = vld [vmem:[%s7009_s19 + $0x9b0] ss:$36 sps:$4 sm:$0xff]  }
 0x297   : > { %4688 = vmatmul.mubr.bf16.vlgmr.msra.gmra.mrb[32].mxu1 %v7102_v9  ;;  %5708 = vmatpush3.bf16.msra.mxu0 %v6643_v52  ;;  %v6652_v9 = vld [vmem:[%s7009_s19 + $0xe30] ss:$36 sps:$4 sm:$0xff]  }
 0x298   : > { %5730 = vmatpush3.bf16.msra.mxu1 %v6644_v54  ;;  %5709 = vmatprep.subr.bf16.mxu0 %v6645_v56  ;;  %v341_v56 = vld [vmem:[#allocation2 + $0x38] sm:$0xff] }
 0x299   : > { %5731 = vmatprep.subr.bf16.mxu1 %v6646_v57  ;;  %4727 = vmatprep.mubr.bf16.mxu0 %v7140_v38  ;;  %v6656_v38 = vld [vmem:[%s7009_s19 + $0xe78] ss:$36 sps:$4 sm:$0xff]  }
 0x29a   : > { %4767 = vmatprep.mubr.bf16.mxu1 %v7144_v39  ;;  %v6657_v39 = vld [vmem:[%s7009_s19 + $0xc80] ss:$36 sps:$4 sm:$0xff]  }
 0x29b   : > { %5710 = vmatpush3.bf16.msra.mxu0 %v6647_v58 }
 0x29c   : > { %5732 = vmatpush3.bf16.msra.mxu1 %v6648_v59  ;;  %5711 = vmatprep.subr.bf16.mxu0 %v6649_v60 }
 0x29d   : > { %5733 = vmatprep.subr.bf16.mxu1 %v6650_v61 }
 0x29f   : > { %5712 = vmatpush3.bf16.msra.mxu0 %v6651_v8 }
 0x2a0   : > { %5734 = vmatpush3.bf16.msra.mxu1 %v6652_v9  ;;  %5713 = vmatprep.subr.bf16.mxu0 %v6653_v62 }
 0x2a1   : > { %5735 = vmatprep.subr.bf16.mxu1 %v6654_v63 }
 0x2a3   : > { %5714 = vmatpush3.bf16.msra.mxu0 %v6655_v0 }
 0x2a4   : > { %5736 = vmatpush3.bf16.msra.mxu1 %v6656_v38  ;;  %5715 = vmatprep.subr.bf16.mxu0 %v6657_v39 }
 0x2a5   : > { %5737 = vmatprep.subr.bf16.mxu1 %v6658_v1 }
 0x2a7   : > { %5716 = vmatpush3.bf16.msra.mxu0 %v6659_v2 }
 0x2a8   : > { %5738 = vmatpush3.bf16.msra.mxu1 %v6660_v3  ;;  %5717 = vmatprep.subr.bf16.mxu0 %v6661_v5 }
 0x2a9   : > { %5739 = vmatprep.subr.bf16.mxu1 %v6662_v6 }
 0x2ab   : > { %5718 = vmatpush3.bf16.msra.mxu0 %v6663_v10 }
 0x2ac   : > { %5740 = vmatpush3.bf16.msra.mxu1 %v6664_v11  ;;  %5719 = vmatprep.subr.bf16.mxu0 %v6665_v12 }
 0x2ad   : > { %5741 = vmatprep.subr.bf16.mxu1 %v6666_v13 }
 0x2af   : > { %5720 = vmatpush3.bf16.msra.mxu0 %v6667_v14 }
 0x2b0   : > { %5742 = vmatpush3.bf16.msra.mxu1 %v6668_v15  ;;  %5721 = vmatprep.subr.bf16.mxu0 %v6669_v16 }
 0x2b1   : > { %5743 = vmatprep.subr.bf16.mxu1 %v6670_v17 }
 0x2b3   : > { %5722 = vmatpush3.bf16.msra.mxu0 %v6671_v20 }
 0x2b4   : > { %5744 = vmatpush3.bf16.msra.mxu1 %v6672_v21 }
 0x2b6   : > { %4728 = vmatmul.mubr.bf16.vlgmr.msra.gmra.mrb[36].mxu0 %v7188_v18 }
 0x2b7   : > { %4768 = vmatmul.mubr.bf16.vlgmr.msra.gmra.mrb[36].mxu1 %v7192_v19 }
 0x2c9   : > { %v4403_v22 = vpop.f32.mrb[20].mxu0 }
 0x2ca   : > { %v4444_v23 = vpop.f32.mrb[20].mxu1  ;;  %v4404_v24 = vadd.f32 %v4403_v22, %v7642_v34  ;;  %v4405_v49 = vpop.f32.mrb[21].mxu0  ;;  %v342_v22 = vld [vmem:[#allocation2 + $0x40] sm:$0xff] }
 0x2cb   : > { %v4446_v53 = vpop.f32.mrb[21].mxu1  ;;  %v4406_v51 = vadd.f32 %v4405_v49, %v7644_v37  ;;  %v4407_v26 = vpop.f32.mrb[22].mxu0  ;;  %v4810_v49 = vlaneseq (!%p5656_p7) }
 0x2cc   : > { %v4448_v27 = vpop.f32.mrb[22].mxu1  ;;  %v4445_v28 = vadd.f32 %v4444_v23, %v4404_v24  ;;  %v4408_v29 = vpop.f32.mrb[23].mxu0 }
 0x2cd   : > { %v4449_v30 = vpop.f32.mrb[23].mxu1  ;;  %v4447_v31 = vadd.f32 %v4446_v53, %v4406_v51  ;;  %v4811_v53 = vshrl.u32 (!%p5656_p7), %v4810_v49, 7  ;;  %v4797_v51 = vld [vmem:[#allocation2] sm:$0xff] (!%p5656_p7)  ;;  %v4798_v29 = vld [vmem:[#allocation2 + $0x8] sm:$0xff] (!%p5656_p7) }
 0x2ce   : > { %v4779_v32 = vadd.f32 %v4445_v28, %v338_v25  ;;  %v4806_v25 = vld [vmem:[#allocation6] sm:$0xff] (!%p5656_p7) }
 0x2cf   : > { %v4780_v18 = vadd.f32 %v4447_v31, %v339_v55  ;;  %v4812_v26 = vsub.s32 (!%p5656_p7), 0, %v4811_v53  ;;  %v4816_v27 = vsub.s32 (!%p5656_p7), 1, %v4811_v53  ;;  %v4820_v28 = vsub.s32 (!%p5656_p7), 2, %v4811_v53  ;;  %v4799_v30 = vld [vmem:[#allocation2 + $0x10] sm:$0xff] (!%p5656_p7)  ;;  %v4800_v31 = vld [vmem:[#allocation2 + $0x18] sm:$0xff] (!%p5656_p7) }
 0x2d0   : > { %4788 = vst [vmem:[#allocation2 + $0x20] sm:$0xff] %v4779_v32  ;;  %v4824_v55 = vsub.s32 (!%p5656_p7), 3, %v4811_v53  ;;  %v4828_v32 = vsub.s32 (!%p5656_p7), 4, %v4811_v53 }
 0x2d1   : > { %4789 = vst [vmem:[#allocation2 + $0x28] sm:$0xff] %v4780_v18  ;;  %v4832_v18 = vsub.s32 (!%p5656_p7), 5, %v4811_v53 }
 0x309   : > { %v4485_v19 = vpop.f32.mrb[24].mxu0 }
 0x30a   : > { %v4526_v33 = vpop.f32.mrb[24].mxu1  ;;  %v4487_v34 = vpop.f32.mrb[25].mxu0 }
 0x30b   : > { %v4527_v35 = vadd.f32 %v4526_v33, %v4485_v19  ;;  %v4528_v36 = vpop.f32.mrb[25].mxu1  ;;  %v4489_v4 = vpop.f32.mrb[26].mxu0  ;;  %v4836_v19 = vsub.s32 (!%p5656_p7), 6, %v4811_v53  ;;  %v4813_v33 = vrot.slane (!%p5656_p7), %v4806_v25, %v4812_v26 }
 0x30c   : > { %v4529_v40 = vadd.f32 %v4528_v36, %v4487_v34  ;;  %v4530_v41 = vpop.f32.mrb[26].mxu1  ;;  %v4490_v37 = vpop.f32.mrb[27].mxu0  ;;  %v4821_v34 = vrot.slane (!%p5656_p7), %v4806_v25, %v4820_v28  ;;  %v4825_v36 = vrot.slane (!%p5656_p7), %v4806_v25, %v4824_v55  ;;  %v4829_v4 = vrot.slane (!%p5656_p7), %v4806_v25, %v4828_v32 }
 0x30d   : > { %v4531_v42 = vpop.f32.mrb[27].mxu1  ;;  %v4833_v41 = vrot.slane (!%p5656_p7), %v4806_v25, %v4832_v18  ;;  %v4840_v37 = vsub.s32 (!%p5656_p7), 7, %v4811_v53 }
 0x30e   : > { %v4855_v42 = vadd.f32 (!%p5656_p7), %v4813_v33, %v4797_v51  ;;  %v5658_v51 = vld [vmem:[#allocation8 + $0x8] ss:$0 sm:$0xff] (!%p5656_p7) }
 0x349   : > { %v4567_v43 = vpop.f32.mrb[28].mxu0 }
 0x34a   : > { %v4608_v44 = vpop.f32.mrb[28].mxu1  ;;  %v4568_v45 = vadd.f32 %v4567_v43, %v4527_v35  ;;  %v4569_v7 = vpop.f32.mrb[29].mxu0  ;;  %v4817_v35 = vrot.slane (!%p5656_p7), %v4806_v25, %v4816_v27 }
 0x34b   : > { %v4610_v46 = vpop.f32.mrb[29].mxu1  ;;  %v4570_v48 = vadd.f32 %v4569_v7, %v4529_v40  ;;  %v4571_v50 = vpop.f32.mrb[30].mxu0  ;;  %v4801_v40 = vld [vmem:[#allocation2 + $0x20] sm:$0xff] (!%p5656_p7)  ;;  %v4802_v7 = vld [vmem:[#allocation2 + $0x28] sm:$0xff] (!%p5656_p7) }
 0x34c   : > { %v4612_v52 = vpop.f32.mrb[30].mxu1  ;;  %v4609_v54 = vadd.f32 %v4608_v44, %v4568_v45  ;;  %v4572_v57 = vpop.f32.mrb[31].mxu0  ;;  %v4856_v43 = vadd.f32 (!%p5656_p7), %v4817_v35, %v4798_v29  ;;  %v4857_v44 = vadd.f32 (!%p5656_p7), %v4821_v34, %v4799_v30  ;;  %v4858_v45 = vadd.f32 (!%p5656_p7), %v4825_v36, %v4800_v31  ;;  %v5659_v31 = vld [vmem:[#allocation3] ss:$0 sm:$0xff] (!%p5656_p7) }
 0x34d   : > { %v4613_v58 = vpop.f32.mrb[31].mxu1  ;;  %v4611_v59 = vadd.f32 %v4610_v46, %v4570_v48  ;;  %v4837_v46 = vrot.slane (!%p5656_p7), %v4806_v25, %v4836_v19  ;;  %v4859_v50 = vadd.f32 (!%p5656_p7), %v4829_v4, %v4801_v40  ;;  %v4864_v52 = vmax.f32 (!%p5656_p7), %v4855_v42, 0.0 }
 0x34e   : > { %v4781_v60 = vadd.f32 %v4609_v54, %v340_v47  ;;  %v4873_v47 = vld [vmem:[#allocation8] sm:$0xff] (!%p5656_p7)  ;;  %v4865_v54 = vmax.f32 (!%p5656_p7), %v4856_v43, 0.0  ;;  %v4866_v57 = vmax.f32 (!%p5656_p7), %v4857_v44, 0.0 }
 0x34f   : > { %v4782_v61 = vadd.f32 %v4611_v59, %v341_v56  ;;  %v4841_v56 = vrot.slane (!%p5656_p7), %v4806_v25, %v4840_v37  ;;  %v4860_v59 = vadd.f32 (!%p5656_p7), %v4833_v41, %v4802_v7 }
 0x350   : > { %4790 = vst [vmem:[#allocation2 + $0x30] sm:$0xff] %v4781_v60  ;;  %v4867_v60 = vmax.f32 (!%p5656_p7), %v4858_v45, 0.0 }
 0x351   : > { %4791 = vst [vmem:[#allocation2 + $0x38] sm:$0xff] %v4782_v61  ;;  %v4880_v61 = vrot.slane (!%p5656_p7), %v4873_v47, %v4812_v26 }
 0x357   : > { %v4803_v48 = vld [vmem:[#allocation2 + $0x30] sm:$0xff] (!%p5656_p7) }
 0x358   : > { %v4804_v58 = vld [vmem:[#allocation2 + $0x38] sm:$0xff] (!%p5656_p7) }
 0x369   : > { %v5679_v8 = vpop.f32.mrb[32].mxu0 }
 0x36a   : > { %v5701_v9 = vpop.f32.mrb[32].mxu1  ;;  %v5680_v62 = vpop.f32.mrb[33].mxu0 }
 0x36b   : > { %v5702_v63 = vpop.f32.mrb[33].mxu1  ;;  %v5681_v0 = vadd.f32 %v5680_v62, %v5679_v8  ;;  %v5682_v39 = vpop.f32.mrb[34].mxu0  ;;  %v4884_v8 = vrot.slane (!%p5656_p7), %v4873_v47, %v4816_v27  ;;  %v4888_v62 = vrot.slane (!%p5656_p7), %v4873_v47, %v4820_v28 }
 0x36c   : > { %v5703_v38 = vadd.f32 %v5702_v63, %v5701_v9  ;;  %v5704_v1 = vpop.f32.mrb[34].mxu1  ;;  %v5683_v2 = vpop.f32.mrb[35].mxu0  ;;  %v4861_v9 = vadd.f32 (!%p5656_p7), %v4837_v46, %v4803_v48  ;;  %v4892_v63 = vrot.slane (!%p5656_p7), %v4873_v47, %v4824_v55  ;;  %v4868_v39 = vmax.f32 (!%p5656_p7), %v4859_v50, 0.0 }
 0x36d   : > { %v5705_v3 = vpop.f32.mrb[35].mxu1  ;;  %v4896_v1 = vrot.slane (!%p5656_p7), %v4873_v47, %v4828_v32  ;;  %v4922_v2 = vmul.f32 (!%p5656_p7), %v4880_v61, %v4864_v52 }
 0x36e   : > { %v4690_v5 = vadd.f32 %v5703_v38, %v5681_v0  ;;  %v5657_v38 = vld [vmem:[#allocation6 + $0x8] ss:$0 sm:$0xff] (!%p5656_p7)  ;;  %v4923_v3 = vmul.f32 (!%p5656_p7), %v4884_v8, %v4865_v54 }
 0x389   : > { %v5723_v6 = vpop.f32.mrb[36].mxu0 }
 0x38a   : > { %v5745_v10 = vpop.f32.mrb[36].mxu1  ;;  %v5724_v11 = vpop.f32.mrb[37].mxu0 }
 0x38b   : > { %v5746_v12 = vpop.f32.mrb[37].mxu1  ;;  %v5725_v13 = vadd.f32 %v5724_v11, %v5723_v6  ;;  %v5726_v15 = vpop.f32.mrb[38].mxu0  ;;  %v4924_v6 = vmul.f32 (!%p5656_p7), %v4888_v62, %v4866_v57  ;;  %v4900_v11 = vrot.slane (!%p5656_p7), %v4873_v47, %v4832_v18 }
 0x38c   : > { %v5747_v14 = vadd.f32 %v5746_v12, %v5745_v10  ;;  %v5748_v16 = vpop.f32.mrb[38].mxu1  ;;  %v5727_v17 = vpop.f32.mrb[39].mxu0  ;;  %v4869_v10 = vmax.f32 (!%p5656_p7), %v4860_v59, 0.0  ;;  %v4925_v12 = vmul.f32 (!%p5656_p7), %v4892_v63, %v4867_v60  ;;  %v4870_v15 = vmax.f32 (!%p5656_p7), %v4861_v9, 0.0 }
 0x38d   : > { %v5749_v20 = vpop.f32.mrb[39].mxu1  ;;  %v4730_v21 = vadd.f32 %v5725_v13, %v4690_v5  ;;  %4796 = sbr.rel (%p5656_p7) target bundleno = 1076 (0x434), region = 60  ;;  %v4862_v5 = vadd.f32 (!%p5656_p7), %v4841_v56, %v4804_v58  ;;  %v4931_v13 = vadd.f32 (!%p5656_p7), %v4923_v3, %v4922_v2  ;;  %v4904_v16 = vrot.slane (!%p5656_p7), %v4873_v47, %v4836_v19 }
 0x38e   : > { %v4926_v17 = vmul.f32 (!%p5656_p7), %v4896_v1, %v4868_v39 }
 0x38f   : > { %v4770_v23 = vadd.f32 %v5747_v14, %v4730_v21  ;;  %v4932_v20 = vadd.f32 (!%p5656_p7), %v4931_v13, %v4924_v6  ;;  %v4871_v21 = vmax.f32 (!%p5656_p7), %v4862_v5, 0.0  ;;  %v4928_v53 = vmul.f32 (!%p5656_p7), %v4904_v16, %v4870_v15 }
 0x391   : > { %v4783_v24 = vadd.f32 %v4770_v23, %v342_v22  ;;  %v4908_v22 = vrot.slane (!%p5656_p7), %v4873_v47, %v4840_v37  ;;  %v4927_v23 = vmul.f32 (!%p5656_p7), %v4900_v11, %v4869_v10 }
 0x393   : > { %4792 = vst [vmem:[#allocation2 + $0x40] sm:$0xff] %v4783_v24  ;;  %v4933_v24 = vadd.f32 (!%p5656_p7), %v4932_v20, %v4925_v12  ;;  %v4929_v26 = vmul.f32 (!%p5656_p7), %v4908_v22, %v4871_v21 }
 0x395   : > { %v4934_v25 = vadd.f32 %v4933_v24, %v4926_v17 }
 0x397   : > { %v4935_v27 = vadd.f32 %v4934_v25, %v4927_v23 }
 0x399   : > { %v4936_v55 = vadd.f32 %v4935_v27, %v4928_v53 }
 0x39a   : > { %v4805_v0 = vld [vmem:[#allocation2 + $0x40] sm:$0xff] }
 0x39b   : > { %v4863_v14 = vadd.f32 %v5657_v38, %v4805_v0  ;;  %v4937_v29 = vadd.f32 %v4936_v55, %v4929_v26 }
 0x39d   : > { %v4872_v49 = vmax.f32 %v4863_v14, 0.0 }
 0x39f   : > { %v4930_v28 = vmul.f32 %v5658_v51, %v4872_v49 }
 0x3a1   : > { %v4938_v30 = vadd.f32 %v4937_v29, %v4930_v28 }
 0x3a3   : > { %4939 = vadd.xlane.f32.xlu0 %v4938_v30 }
 0x430   : > { %v4940_v32 = vpop.xlane.xlu0 %4939 }
 0x431   : > { %v4948_v18 = vadd.f32 %v5659_v31, %v4940_v32 }
 0x433   : > { %4950 = vst.msk [vmem:[%s7719_s5] sm:$0xff] %vm4949_vm0, %v4948_v18 }
 0x434 PF: > { %s21_s25 = sadd.s32 1, %s6813_s25   ;;  %s7734_s20 = smov %s6797_s21 }
 0x435   : > { %p18_p9 = scmp.ge.s32.totalorder %s21_s25, 7   ;;  %s7735_s21 = smov %s6801_s22 }
 0x436   : > { %s7736_s22 = smov %s6976_s10  ;;  %s7737_s23 = smov %s6809_s24 }
 0x437   : > { %s7738_s24 = smov %s7740_s30  ;;  %20 = sbr.rel (!%p18_p9) target bundleno = 8 (0x8), region = 99 }
 0x43e   :  { %4970 = vsyncpa [#allocation5], 1 }
 0x43f   :  { %4972 = vsyncpa [#allocation5 + $0x1], 1 }
 0x440   :  { %4973 = vsyncpa [#allocation7], 1 }

</bundles_post_ra>
